<compile_context>
chip_gen: v7x
topology: tpu7x:2x2x1
jax: 0.10.0
libtpu: 0.0.40
codegen_flags: <defaults>
</compile_context>

<pallas_src>
import functools
import math

import jax
import jax.numpy as jnp
from jax.experimental import pallas as pl
from jax.experimental.pallas import tpu as pltpu

LN_EPS = 1e-12  # DistilBERT LayerNorm eps


# ----------------------------- kernel helpers ------------------------------

def _layernorm(x, g, b):
    mu = jnp.mean(x, axis=-1, keepdims=True)
    var = jnp.mean((x - mu) ** 2, axis=-1, keepdims=True)
    return (x - mu) * jax.lax.rsqrt(var + LN_EPS) * g + b


def _gelu(x):
    # TODO(synk): DistilBERT uses the exact erf-based GELU; tanh approximation kept
    # since erf has no guaranteed Mosaic lowering.
    c = math.sqrt(2.0 / math.pi)
    return 0.5 * x * (1.0 + jnp.tanh(c * (x + 0.044715 * x * x * x)))


# ------------------------------ fused kernel -------------------------------

def _fused_kernel(n_heads, n_layers,
                  emb_ref, mask_ref, emb_g, emb_b,
                  wqkvh, bqkvh, woh, bo, ln1g, ln1b, w1, b1, w2, b2, ln2g, ln2b,
                  fc_w, fc_b, fc2_w, fc2_b,
                  out_ref, x_scr):
    l = pl.program_id(1)

    # First layer step for this batch element: embeddings -> LayerNorm -> VMEM-resident x.
    @pl.when(l == 0)
    def _():
        x_scr[...] = _layernorm(emb_ref[0], emb_g[...], emb_b[...])

    x = x_scr[...]                                   # (S, D) float32, VMEM resident
    S, D = x.shape
    H = n_heads
    dh = D // H
    scale = 1.0 / math.sqrt(dh)

    mask = mask_ref[0]                               # (1, S) float32 (1 = keep, 0 = pad)
    mbias = jnp.where(mask < 0.5, -1e9, 0.0)         # additive key mask

    x_bf = x.astype(jnp.bfloat16)

    # --- Multi-head self-attention (head-batched, bf16 MXU inputs, f32 accum) ---
    # Packed head-major QKV projection: one stacked (3H, D, dh) weight tensor per layer.
    xb = jnp.broadcast_to(x_bf, (3 * H, S, D))
    qkv = jnp.einsum('hsd,hdk->hsk', xb, wqkvh[0],
                     preferred_element_type=jnp.float32) + bqkvh[0]      # (3H, S, dh)
    q = qkv[:H] * scale                                                   # (H, S, dh)
    k = qkv[H:2 * H]
    v = qkv[2 * H:]

    scores = jnp.einsum('hqd,hkd->hqk',
                        q.astype(jnp.bfloat16), k.astype(jnp.bfloat16),
                        preferred_element_type=jnp.float32) + mbias       # (H, S, S)
    m = jnp.max(scores, axis=-1, keepdims=True)
    e = jnp.exp(scores - m)
    p = e * pl.reciprocal(jnp.sum(e, axis=-1, keepdims=True), approx=True)
    ctx = jnp.einsum('hqk,hkd->hqd',
                     p.astype(jnp.bfloat16), v.astype(jnp.bfloat16),
                     preferred_element_type=jnp.float32)                  # (H, S, dh)

    # Output projection folded per head: sum_h ctx_h @ Wo[h] == concat_h(ctx_h) @ Wo.
    attn = jnp.sum(jnp.einsum('hsd,hdk->hsk',
                              ctx.astype(jnp.bfloat16), woh[0],
                              preferred_element_type=jnp.float32), axis=0) + bo[0]

    h1 = _layernorm(attn + x, ln1g[0], ln1b[0])

    # --- Feed-forward ---
    ff = jnp.dot(h1.astype(jnp.bfloat16), w1[0],
                 preferred_element_type=jnp.float32) + b1[0]
    ff = jnp.dot(_gelu(ff).astype(jnp.bfloat16), w2[0],
                 preferred_element_type=jnp.float32) + b2[0]
    x_new = _layernorm(ff + h1, ln2g[0], ln2b[0])
    x_scr[...] = x_new

    # --- Classifier head (only after the last encoder layer) ---
    @pl.when(l == n_layers - 1)
    def _():
        cls = x_new[:1, :]                           # [CLS] token, (1, D)
        z = jnp.maximum(
            jnp.dot(cls.astype(jnp.bfloat16), fc_w[...],
                    preferred_element_type=jnp.float32) + fc_b[...], 0.0)
        # nn.Dropout in eval mode == identity
        z = jnp.dot(z.astype(jnp.bfloat16), fc2_w[...],
                    preferred_element_type=jnp.float32) + fc2_b[...]
        out_ref[0] = jax.nn.sigmoid(z)


# ------------------------------ pallas wrapper ------------------------------

def _const_spec(shape):
    n = len(shape)
    return pl.BlockSpec(shape, lambda b, l, _n=n: (0,) * _n)


def _layer_spec(shape):
    n = len(shape)
    return pl.BlockSpec(shape, lambda b, l, _n=n: (l,) + (0,) * (_n - 1))


def forward(params, input_ids, attention_mask):
    assert input_ids.ndim == 2, f"Expected 2D input_ids, got {input_ids.ndim}D"
    assert attention_mask.ndim == 2, f"Expected 2D attention_mask, got {attention_mask.ndim}D"
    B, S = input_ids.shape
    D = params["word_emb"].shape[1]
    H = params["n_heads"]
    L = params["n_layers"]
    dh = D // H
    F = params["w1"].shape[2]
    HID = params["fc_w"].shape[1]
    O = params["fc2_w"].shape[1]

    # Embedding lookup is a gather -> plain JAX glue; everything else is one fused kernel.
    emb = (params["word_emb"][input_ids]
           + params["pos_emb"][jnp.arange(S)][None, :, :]).astype(jnp.float32)
    mask3 = attention_mask.astype(jnp.float32).reshape(B, 1, S)

    in_specs = [
        pl.BlockSpec((1, S, D), lambda b, l: (b, 0, 0)),   # embeddings
        pl.BlockSpec((1, 1, S), lambda b, l: (b, 0, 0)),   # attention mask
        _const_spec((1, D)), _const_spec((1, D)),          # embedding LayerNorm
        _layer_spec((1, 3 * H, D, dh)),                    # packed head-major Wqkv
        _layer_spec((1, 3 * H, 1, dh)),                    # packed head-major bqkv
        _layer_spec((1, H, dh, D)),                        # head-split Wo
        _layer_spec((1, 1, D)),                            # bo
        _layer_spec((1, 1, D)), _layer_spec((1, 1, D)),    # LN1
        _layer_spec((1, D, F)), _layer_spec((1, 1, F)),    # FFN lin1
        _layer_spec((1, F, D)), _layer_spec((1, 1, D)),    # FFN lin2
        _layer_spec((1, 1, D)), _layer_spec((1, 1, D)),    # LN2
        _const_spec((D, HID)), _const_spec((1, HID)),      # fc
        _const_spec((HID, O)), _const_spec((1, O)),        # fc2
    ]

    out = pl.pallas_call(
        functools.partial(_fused_kernel, H, L),
        out_shape=jax.ShapeDtypeStruct((B, 1, O), jnp.float32),
        grid=(B, L),
        in_specs=in_specs,
        out_specs=pl.BlockSpec((1, 1, O), lambda b, l: (b, 0, 0)),
        scratch_shapes=[pltpu.VMEM((S, D), jnp.float32)],
        compiler_params=pltpu.CompilerParams(
            dimension_semantics=("parallel", "arbitrary")),
    )(emb, mask3, params["emb_ln_g"], params["emb_ln_b"],
      params["wqkvh"], params["bqkvh"], params["woh"], params["bo"],
      params["ln1g"], params["ln1b"], params["w1"], params["b1"],
      params["w2"], params["b2"], params["ln2g"], params["ln2b"],
      params["fc_w"], params["fc_b"], params["fc2_w"], params["fc2_b"])
    return out[:, 0, :]


# ------------------------------ params & packing ------------------------------

def init_params(key, *, vocab, max_pos, d_model, n_heads, n_layers, ffn,
                hidden_size, output_size):
    D, H, L, F = d_model, n_heads, n_layers, ffn
    dh = D // H
    ks = iter(jax.random.split(key, 64))
    nrm = lambda shape: 0.02 * jax.random.normal(next(ks), shape, jnp.float32)
    bf16 = lambda w: w.astype(jnp.bfloat16)

    # Standard (in, out) weights, then packed head-major + layer-stacked for the kernel.
    wq, wk, wv, wo = nrm((L, D, D)), nrm((L, D, D)), nrm((L, D, D)), nrm((L, D, D))
    bq = jnp.zeros((L, D), jnp.float32)
    bk = jnp.zeros((L, D), jnp.float32)
    bv = jnp.zeros((L, D), jnp.float32)

    def head_major(w):     # (L, D, D_out) -> (L, H, D, dh): W[:, :, h*dh+j] == out[:, h, :, j]
        return w.reshape(L, D, H, dh).transpose(0, 2, 1, 3)

    def head_major_b(b_):  # (L, D_out) -> (L, H, 1, dh)
        return b_.reshape(L, H, 1, dh)

    wqkvh = jnp.concatenate([head_major(wq), head_major(wk), head_major(wv)], axis=1)
    bqkvh = jnp.concatenate([head_major_b(bq), head_major_b(bk), head_major_b(bv)], axis=1)
    woh = wo.reshape(L, H, dh, D)   # split the concat-input dim of Wo per head

    return {
        "n_heads": H, "n_layers": L,
        "word_emb": nrm((vocab, D)),
        "pos_emb": nrm((max_pos, D)),
        "emb_ln_g": jnp.ones((1, D), jnp.float32),
        "emb_ln_b": jnp.zeros((1, D), jnp.float32),
        "wqkvh": bf16(wqkvh), "bqkvh": bqkvh,
        "woh": bf16(woh), "bo": jnp.zeros((L, 1, D), jnp.float32),
        "ln1g": jnp.ones((L, 1, D), jnp.float32),
        "ln1b": jnp.zeros((L, 1, D), jnp.float32),
        "w1": bf16(nrm((L, D, F))), "b1": jnp.zeros((L, 1, F), jnp.float32),
        "w2": bf16(nrm((L, F, D))), "b2": jnp.zeros((L, 1, D), jnp.float32),
        "ln2g": jnp.ones((L, 1, D), jnp.float32),
        "ln2b": jnp.zeros((L, 1, D), jnp.float32),
        "fc_w": bf16(nrm((D, hidden_size))),
        "fc_b": jnp.zeros((1, hidden_size), jnp.float32),
        "fc2_w": bf16(nrm((hidden_size, output_size))),
        "fc2_b": jnp.zeros((1, output_size), jnp.float32),
    }


# ---------------------------------- main ----------------------------------

if __name__ == "__main__":
    B, S = 2, 8
    VOCAB, MAX_POS = 100, 32
    D_MODEL, N_HEADS, N_LAYERS, FFN = 64, 4, 2, 128
    HIDDEN_SIZE, OUTPUT_SIZE = 32, 5

    root = jax.random.PRNGKey(0)
    k_params, k_ids = jax.random.split(root)

    params = init_params(k_params, vocab=VOCAB, max_pos=MAX_POS, d_model=D_MODEL,
                         n_heads=N_HEADS, n_layers=N_LAYERS, ffn=FFN,
                         hidden_size=HIDDEN_SIZE, output_size=OUTPUT_SIZE)

    input_ids = jax.random.randint(k_ids, (B, S), 0, VOCAB, dtype=jnp.int32)
    lengths = jnp.array([[S], [5]], dtype=jnp.int32)
    attention_mask = (jnp.arange(S)[None, :] < lengths).astype(jnp.int32)

    out = forward(params, input_ids, attention_mask)
    out = jax.block_until_ready(out)

    assert out.shape == (B, OUTPUT_SIZE), out.shape
    assert bool(jnp.all(jnp.isfinite(out)))
    assert bool(jnp.all((out >= 0.0) & (out <= 1.0)))
    print("KERNEL_OK")
</pallas_src>

<mosaic_0001>
module attributes {stable_mosaic.version = 11 : i64} {
  func.func @_fused_kernel(%arg0: i32, %arg1: i32, %arg2: memref<1x8x64xf32, #tpu.memory_space<vmem>>, %arg3: memref<1x1x8xf32, #tpu.memory_space<vmem>>, %arg4: memref<1x64xf32, #tpu.memory_space<vmem>>, %arg5: memref<1x64xf32, #tpu.memory_space<vmem>>, %arg6: memref<1x12x64x16xbf16, #tpu.memory_space<vmem>>, %arg7: memref<1x12x1x16xf32, #tpu.memory_space<vmem>>, %arg8: memref<1x4x16x64xbf16, #tpu.memory_space<vmem>>, %arg9: memref<1x1x64xf32, #tpu.memory_space<vmem>>, %arg10: memref<1x1x64xf32, #tpu.memory_space<vmem>>, %arg11: memref<1x1x64xf32, #tpu.memory_space<vmem>>, %arg12: memref<1x64x128xbf16, #tpu.memory_space<vmem>>, %arg13: memref<1x1x128xf32, #tpu.memory_space<vmem>>, %arg14: memref<1x128x64xbf16, #tpu.memory_space<vmem>>, %arg15: memref<1x1x64xf32, #tpu.memory_space<vmem>>, %arg16: memref<1x1x64xf32, #tpu.memory_space<vmem>>, %arg17: memref<1x1x64xf32, #tpu.memory_space<vmem>>, %arg18: memref<64x32xbf16, #tpu.memory_space<vmem>>, %arg19: memref<1x32xf32, #tpu.memory_space<vmem>>, %arg20: memref<32x5xbf16, #tpu.memory_space<vmem>>, %arg21: memref<1x5xf32, #tpu.memory_space<vmem>>, %arg22: memref<1x1x5xf32, #tpu.memory_space<vmem>>, %arg23: memref<8x64xf32, #tpu.memory_space<vmem>>) attributes {dimension_semantics = [#tpu.dimension_semantics<parallel>, #tpu.dimension_semantics<arbitrary>], iteration_bounds = array<i64: 2, 2>, scalar_prefetch = 0 : i64, scratch_operands = 1 : i64, tpu.core_type = #tpu.core_type<tc>, window_params = [{transform_indices = @transform_0, window_bounds = array<i64: 1, 8, 64>}, {transform_indices = @transform_1, window_bounds = array<i64: 1, 1, 8>}, {pipeline_mode = #tpu.pipeline_mode<synchronous>, transform_indices = @transform_2, window_bounds = array<i64: 1, 64>}, {pipeline_mode = #tpu.pipeline_mode<synchronous>, transform_indices = @transform_3, window_bounds = array<i64: 1, 64>}, {transform_indices = @transform_4, window_bounds = array<i64: 1, 12, 64, 16>}, {transform_indices = @transform_5, window_bounds = array<i64: 1, 12, 1, 16>}, {transform_indices = @transform_6, window_bounds = array<i64: 1, 4, 16, 64>}, {transform_indices = @transform_7, window_bounds = array<i64: 1, 1, 64>}, {transform_indices = @transform_8, window_bounds = array<i64: 1, 1, 64>}, {transform_indices = @transform_9, window_bounds = array<i64: 1, 1, 64>}, {transform_indices = @transform_10, window_bounds = array<i64: 1, 64, 128>}, {transform_indices = @transform_11, window_bounds = array<i64: 1, 1, 128>}, {transform_indices = @transform_12, window_bounds = array<i64: 1, 128, 64>}, {transform_indices = @transform_13, window_bounds = array<i64: 1, 1, 64>}, {transform_indices = @transform_14, window_bounds = array<i64: 1, 1, 64>}, {transform_indices = @transform_15, window_bounds = array<i64: 1, 1, 64>}, {pipeline_mode = #tpu.pipeline_mode<synchronous>, transform_indices = @transform_16, window_bounds = array<i64: 64, 32>}, {pipeline_mode = #tpu.pipeline_mode<synchronous>, transform_indices = @transform_17, window_bounds = array<i64: 1, 32>}, {pipeline_mode = #tpu.pipeline_mode<synchronous>, transform_indices = @transform_18, window_bounds = array<i64: 32, 5>}, {pipeline_mode = #tpu.pipeline_mode<synchronous>, transform_indices = @transform_19, window_bounds = array<i64: 1, 5>}, {transform_indices = @transform_20, window_bounds = array<i64: 1, 1, 5>}]} {
    %c0_i32 = arith.constant 0 : i32
    %0 = arith.cmpi eq, %arg1, %c0_i32 : i32
    %1 = arith.extui %0 : i1 to i32
    %c0_i32_0 = arith.constant 0 : i32
    %2 = arith.cmpi ne, %1, %c0_i32_0 : i32
    scf.if %2 {
      %c0_73 = arith.constant 0 : index
      %c0_74 = arith.constant 0 : index
      %c0_75 = arith.constant 0 : index
      %141 = vector.load %arg2[%c0_73, %c0_74, %c0_75] : memref<1x8x64xf32, #tpu.memory_space<vmem>>, vector<1x8x64xf32>
      %142 = vector.shape_cast %141 : vector<1x8x64xf32> to vector<8x64xf32>
      %c0_76 = arith.constant 0 : index
      %c0_77 = arith.constant 0 : index
      %143 = vector.load %arg4[%c0_76, %c0_77] : memref<1x64xf32, #tpu.memory_space<vmem>>, vector<1x64xf32>
      %c0_78 = arith.constant 0 : index
      %c0_79 = arith.constant 0 : index
      %144 = vector.load %arg5[%c0_78, %c0_79] : memref<1x64xf32, #tpu.memory_space<vmem>>, vector<1x64xf32>
      %cst_80 = arith.constant dense<0.000000e+00> : vector<8xf32>
      %145 = vector.multi_reduction <add>, %142, %cst_80 [1] : vector<8x64xf32> to vector<8xf32>
      %146 = vector.shape_cast %145 : vector<8xf32> to vector<8x1xf32>
      %cst_81 = arith.constant 6.400000e+01 : f32
      %147 = vector.broadcast %cst_81 : f32 to vector<8x1xf32>
      %148 = arith.divf %146, %147 : vector<8x1xf32>
      %149 = vector.broadcast %148 : vector<8x1xf32> to vector<8x64xf32>
      %150 = arith.subf %142, %149 : vector<8x64xf32>
      %151 = arith.mulf %150, %150 : vector<8x64xf32>
      %cst_82 = arith.constant dense<0.000000e+00> : vector<8xf32>
      %152 = vector.multi_reduction <add>, %151, %cst_82 [1] : vector<8x64xf32> to vector<8xf32>
      %153 = vector.shape_cast %152 : vector<8xf32> to vector<8x1xf32>
      %cst_83 = arith.constant 6.400000e+01 : f32
      %154 = vector.broadcast %cst_83 : f32 to vector<8x1xf32>
      %155 = arith.divf %153, %154 : vector<8x1xf32>
      %156 = vector.broadcast %148 : vector<8x1xf32> to vector<8x64xf32>
      %157 = arith.subf %142, %156 : vector<8x64xf32>
      %cst_84 = arith.constant 9.99999996E-13 : f32
      %158 = vector.broadcast %cst_84 : f32 to vector<8x1xf32>
      %159 = arith.addf %155, %158 : vector<8x1xf32>
      %160 = math.rsqrt %159 : vector<8x1xf32>
      %161 = vector.broadcast %160 : vector<8x1xf32> to vector<8x64xf32>
      %162 = arith.mulf %157, %161 : vector<8x64xf32>
      %163 = vector.broadcast %143 : vector<1x64xf32> to vector<8x64xf32>
      %164 = arith.mulf %162, %163 : vector<8x64xf32>
      %165 = vector.broadcast %144 : vector<1x64xf32> to vector<8x64xf32>
      %166 = arith.addf %164, %165 : vector<8x64xf32>
      %c0_85 = arith.constant 0 : index
      %c0_86 = arith.constant 0 : index
      %167 = vector.load %arg23[%c0_85, %c0_86] : memref<8x64xf32, #tpu.memory_space<vmem>>, vector<8x64xf32>
      tpu.vector_store %arg23[%c0_85, %c0_86], %166 {strides = array<i32>} : memref<8x64xf32, #tpu.memory_space<vmem>>, vector<8x64xf32>,
    } else {
    }
    %c0 = arith.constant 0 : index
    %c0_1 = arith.constant 0 : index
    %3 = vector.load %arg23[%c0, %c0_1] : memref<8x64xf32, #tpu.memory_space<vmem>>, vector<8x64xf32>
    %c0_2 = arith.constant 0 : index
    %c0_3 = arith.constant 0 : index
    %c0_4 = arith.constant 0 : index
    %4 = vector.load %arg3[%c0_2, %c0_3, %c0_4] : memref<1x1x8xf32, #tpu.memory_space<vmem>>, vector<1x1x8xf32>
    %5 = vector.shape_cast %4 : vector<1x1x8xf32> to vector<1x8xf32>
    %cst = arith.constant 5.000000e-01 : f32
    %6 = vector.broadcast %cst : f32 to vector<1x8xf32>
    %7 = arith.cmpf olt, %5, %6 : vector<1x8xf32>
    %cst_5 = arith.constant -1.000000e+09 : f32
    %cst_6 = arith.constant 0.000000e+00 : f32
    %8 = vector.broadcast %cst_5 : f32 to vector<1x8xf32>
    %9 = vector.broadcast %cst_6 : f32 to vector<1x8xf32>
    %10 = arith.select %7, %8, %9 : vector<1x8xi1>, vector<1x8xf32>
    %11 = arith.truncf %3 : vector<8x64xf32> to vector<8x64xbf16>
    %12 = vector.shape_cast %11 : vector<8x64xbf16> to vector<1x8x64xbf16>
    %13 = vector.broadcast %12 : vector<1x8x64xbf16> to vector<12x8x64xbf16>
    %c0_7 = arith.constant 0 : index
    %c0_8 = arith.constant 0 : index
    %c0_9 = arith.constant 0 : index
    %c0_10 = arith.constant 0 : index
    %14 = vector.load %arg6[%c0_7, %c0_8, %c0_9, %c0_10] : memref<1x12x64x16xbf16, #tpu.memory_space<vmem>>, vector<1x12x64x16xbf16>
    %15 = vector.shape_cast %14 : vector<1x12x64x16xbf16> to vector<12x64x16xbf16>
    "tpu.trace_start"() <{level = 10 : i32, message = "hsd,hdk->hsk"}> : () -> ()
    %cst_11 = arith.constant dense<0.000000e+00> : vector<12x8x16xf32>
    %16 = tpu.matmul %13, %15, %cst_11 {dimension_numbers = #tpu.dot_dimension_numbers<[2], [1], [1], [2], [0, 0, 0, 1, 1, 2], [0], [0]>} : vector<12x8x64xbf16>, vector<12x64x16xbf16>, vector<12x8x16xf32> -> vector<12x8x16xf32>
    "tpu.trace_stop"() : () -> ()
    %c0_12 = arith.constant 0 : index
    %c0_13 = arith.constant 0 : index
    %c0_14 = arith.constant 0 : index
    %c0_15 = arith.constant 0 : index
    %17 = vector.load %arg7[%c0_12, %c0_13, %c0_14, %c0_15] : memref<1x12x1x16xf32, #tpu.memory_space<vmem>>, vector<1x12x1x16xf32>
    %18 = vector.shape_cast %17 : vector<1x12x1x16xf32> to vector<12x1x16xf32>
    %19 = vector.broadcast %18 : vector<12x1x16xf32> to vector<12x8x16xf32>
    %20 = arith.addf %16, %19 : vector<12x8x16xf32>
    %21 = vector.extract_strided_slice %20 {offsets = [0, 0, 0], sizes = [4, 8, 16], strides = [1, 1, 1]} : vector<12x8x16xf32> to vector<4x8x16xf32>
    %cst_16 = arith.constant 2.500000e-01 : f32
    %22 = vector.broadcast %cst_16 : f32 to vector<4x8x16xf32>
    %23 = arith.mulf %21, %22 : vector<4x8x16xf32>
    %24 = vector.extract_strided_slice %20 {offsets = [4, 0, 0], sizes = [4, 8, 16], strides = [1, 1, 1]} : vector<12x8x16xf32> to vector<4x8x16xf32>
    %25 = vector.extract_strided_slice %20 {offsets = [8, 0, 0], sizes = [4, 8, 16], strides = [1, 1, 1]} : vector<12x8x16xf32> to vector<4x8x16xf32>
    %26 = arith.truncf %23 : vector<4x8x16xf32> to vector<4x8x16xbf16>
    %27 = arith.truncf %24 : vector<4x8x16xf32> to vector<4x8x16xbf16>
    "tpu.trace_start"() <{level = 10 : i32, message = "hqd,hkd->hqk"}> : () -> ()
    %cst_17 = arith.constant dense<0.000000e+00> : vector<4x8x8xf32>
    %28 = tpu.matmul %26, %27, %cst_17 {dimension_numbers = #tpu.dot_dimension_numbers<[2], [2], [1], [1], [0, 0, 0, 1, 1, 1], [0], [0]>} : vector<4x8x16xbf16>, vector<4x8x16xbf16>, vector<4x8x8xf32> -> vector<4x8x8xf32>
    "tpu.trace_stop"() : () -> ()
    %29 = vector.shape_cast %10 : vector<1x8xf32> to vector<1x1x8xf32>
    %30 = vector.broadcast %29 : vector<1x1x8xf32> to vector<4x8x8xf32>
    %31 = arith.addf %28, %30 : vector<4x8x8xf32>
    %cst_18 = arith.constant dense<0xFF800000> : vector<4x8xf32>
    %32 = vector.multi_reduction <maximumf>, %31, %cst_18 [2] : vector<4x8x8xf32> to vector<4x8xf32>
    %33 = vector.shape_cast %32 : vector<4x8xf32> to vector<4x8x1xf32>
    %34 = vector.broadcast %33 : vector<4x8x1xf32> to vector<4x8x8xf32>
    %35 = arith.subf %31, %34 : vector<4x8x8xf32>
    %36 = math.exp %35 : vector<4x8x8xf32>
    %cst_19 = arith.constant dense<0.000000e+00> : vector<4x8xf32>
    %37 = vector.multi_reduction <add>, %36, %cst_19 [2] : vector<4x8x8xf32> to vector<4x8xf32>
    %38 = vector.shape_cast %37 : vector<4x8xf32> to vector<4x8x1xf32>
    %39 = tpu.reciprocal %38 {approx = true} : vector<4x8x1xf32> -> vector<4x8x1xf32>
    %40 = vector.broadcast %39 : vector<4x8x1xf32> to vector<4x8x8xf32>
    %41 = arith.mulf %36, %40 : vector<4x8x8xf32>
    %42 = arith.truncf %41 : vector<4x8x8xf32> to vector<4x8x8xbf16>
    %43 = arith.truncf %25 : vector<4x8x16xf32> to vector<4x8x16xbf16>
    "tpu.trace_start"() <{level = 10 : i32, message = "hqk,hkd->hqd"}> : () -> ()
    %cst_20 = arith.constant dense<0.000000e+00> : vector<4x8x16xf32>
    %44 = tpu.matmul %42, %43, %cst_20 {dimension_numbers = #tpu.dot_dimension_numbers<[2], [1], [1], [2], [0, 0, 0, 1, 1, 2], [0], [0]>} : vector<4x8x8xbf16>, vector<4x8x16xbf16>, vector<4x8x16xf32> -> vector<4x8x16xf32>
    "tpu.trace_stop"() : () -> ()
    %45 = arith.truncf %44 : vector<4x8x16xf32> to vector<4x8x16xbf16>
    %c0_21 = arith.constant 0 : index
    %c0_22 = arith.constant 0 : index
    %c0_23 = arith.constant 0 : index
    %c0_24 = arith.constant 0 : index
    %46 = vector.load %arg8[%c0_21, %c0_22, %c0_23, %c0_24] : memref<1x4x16x64xbf16, #tpu.memory_space<vmem>>, vector<1x4x16x64xbf16>
    %47 = vector.shape_cast %46 : vector<1x4x16x64xbf16> to vector<4x16x64xbf16>
    "tpu.trace_start"() <{level = 10 : i32, message = "hsd,hdk->hsk"}> : () -> ()
    %cst_25 = arith.constant dense<0.000000e+00> : vector<4x8x64xf32>
    %48 = tpu.matmul %45, %47, %cst_25 {dimension_numbers = #tpu.dot_dimension_numbers<[2], [1], [1], [2], [0, 0, 0, 1, 1, 2], [0], [0]>} : vector<4x8x16xbf16>, vector<4x16x64xbf16>, vector<4x8x64xf32> -> vector<4x8x64xf32>
    "tpu.trace_stop"() : () -> ()
    %cst_26 = arith.constant dense<0.000000e+00> : vector<8x64xf32>
    %49 = vector.multi_reduction <add>, %48, %cst_26 [0] : vector<4x8x64xf32> to vector<8x64xf32>
    %c0_27 = arith.constant 0 : index
    %c0_28 = arith.constant 0 : index
    %c0_29 = arith.constant 0 : index
    %50 = vector.load %arg9[%c0_27, %c0_28, %c0_29] : memref<1x1x64xf32, #tpu.memory_space<vmem>>, vector<1x1x64xf32>
    %51 = vector.shape_cast %50 : vector<1x1x64xf32> to vector<1x64xf32>
    %52 = vector.broadcast %51 : vector<1x64xf32> to vector<8x64xf32>
    %53 = arith.addf %49, %52 : vector<8x64xf32>
    %54 = arith.addf %53, %3 : vector<8x64xf32>
    %c0_30 = arith.constant 0 : index
    %c0_31 = arith.constant 0 : index
    %c0_32 = arith.constant 0 : index
    %55 = vector.load %arg10[%c0_30, %c0_31, %c0_32] : memref<1x1x64xf32, #tpu.memory_space<vmem>>, vector<1x1x64xf32>
    %56 = vector.shape_cast %55 : vector<1x1x64xf32> to vector<1x64xf32>
    %c0_33 = arith.constant 0 : index
    %c0_34 = arith.constant 0 : index
    %c0_35 = arith.constant 0 : index
    %57 = vector.load %arg11[%c0_33, %c0_34, %c0_35] : memref<1x1x64xf32, #tpu.memory_space<vmem>>, vector<1x1x64xf32>
    %58 = vector.shape_cast %57 : vector<1x1x64xf32> to vector<1x64xf32>
    %cst_36 = arith.constant dense<0.000000e+00> : vector<8xf32>
    %59 = vector.multi_reduction <add>, %54, %cst_36 [1] : vector<8x64xf32> to vector<8xf32>
    %60 = vector.shape_cast %59 : vector<8xf32> to vector<8x1xf32>
    %cst_37 = arith.constant 6.400000e+01 : f32
    %61 = vector.broadcast %cst_37 : f32 to vector<8x1xf32>
    %62 = arith.divf %60, %61 : vector<8x1xf32>
    %63 = vector.broadcast %62 : vector<8x1xf32> to vector<8x64xf32>
    %64 = arith.subf %54, %63 : vector<8x64xf32>
    %65 = arith.mulf %64, %64 : vector<8x64xf32>
    %cst_38 = arith.constant dense<0.000000e+00> : vector<8xf32>
    %66 = vector.multi_reduction <add>, %65, %cst_38 [1] : vector<8x64xf32> to vector<8xf32>
    %67 = vector.shape_cast %66 : vector<8xf32> to vector<8x1xf32>
    %cst_39 = arith.constant 6.400000e+01 : f32
    %68 = vector.broadcast %cst_39 : f32 to vector<8x1xf32>
    %69 = arith.divf %67, %68 : vector<8x1xf32>
    %70 = vector.broadcast %62 : vector<8x1xf32> to vector<8x64xf32>
    %71 = arith.subf %54, %70 : vector<8x64xf32>
    %cst_40 = arith.constant 9.99999996E-13 : f32
    %72 = vector.broadcast %cst_40 : f32 to vector<8x1xf32>
    %73 = arith.addf %69, %72 : vector<8x1xf32>
    %74 = math.rsqrt %73 : vector<8x1xf32>
    %75 = vector.broadcast %74 : vector<8x1xf32> to vector<8x64xf32>
    %76 = arith.mulf %71, %75 : vector<8x64xf32>
    %77 = vector.broadcast %56 : vector<1x64xf32> to vector<8x64xf32>
    %78 = arith.mulf %76, %77 : vector<8x64xf32>
    %79 = vector.broadcast %58 : vector<1x64xf32> to vector<8x64xf32>
    %80 = arith.addf %78, %79 : vector<8x64xf32>
    %81 = arith.truncf %80 : vector<8x64xf32> to vector<8x64xbf16>
    %c0_41 = arith.constant 0 : index
    %c0_42 = arith.constant 0 : index
    %c0_43 = arith.constant 0 : index
    %82 = vector.load %arg12[%c0_41, %c0_42, %c0_43] : memref<1x64x128xbf16, #tpu.memory_space<vmem>>, vector<1x64x128xbf16>
    %83 = vector.shape_cast %82 : vector<1x64x128xbf16> to vector<64x128xbf16>
    %cst_44 = arith.constant dense<0.000000e+00> : vector<8x128xf32>
    %84 = tpu.matmul %81, %83, %cst_44 {dimension_numbers = #tpu.dot_dimension_numbers<[1], [0], [0], [1], [0, 0, 1, 1], [], []>} : vector<8x64xbf16>, vector<64x128xbf16>, vector<8x128xf32> -> vector<8x128xf32>
    %c0_45 = arith.constant 0 : index
    %c0_46 = arith.constant 0 : index
    %c0_47 = arith.constant 0 : index
    %85 = vector.load %arg13[%c0_45, %c0_46, %c0_47] : memref<1x1x128xf32, #tpu.memory_space<vmem>>, vector<1x1x128xf32>
    %86 = vector.shape_cast %85 : vector<1x1x128xf32> to vector<1x128xf32>
    %87 = vector.broadcast %86 : vector<1x128xf32> to vector<8x128xf32>
    %88 = arith.addf %84, %87 : vector<8x128xf32>
    %cst_48 = arith.constant 5.000000e-01 : f32
    %89 = vector.broadcast %cst_48 : f32 to vector<8x128xf32>
    %90 = arith.mulf %89, %88 : vector<8x128xf32>
    %cst_49 = arith.constant 4.471500e-02 : f32
    %91 = vector.broadcast %cst_49 : f32 to vector<8x128xf32>
    %92 = arith.mulf %91, %88 : vector<8x128xf32>
    %93 = arith.mulf %92, %88 : vector<8x128xf32>
    %94 = arith.mulf %93, %88 : vector<8x128xf32>
    %95 = arith.addf %88, %94 : vector<8x128xf32>
    %cst_50 = arith.constant 0.797884583 : f32
    %96 = vector.broadcast %cst_50 : f32 to vector<8x128xf32>
    %97 = arith.mulf %96, %95 : vector<8x128xf32>
    %98 = math.tanh %97 : vector<8x128xf32>
    %cst_51 = arith.constant 1.000000e+00 : f32
    %99 = vector.broadcast %cst_51 : f32 to vector<8x128xf32>
    %100 = arith.addf %99, %98 : vector<8x128xf32>
    %101 = arith.mulf %90, %100 : vector<8x128xf32>
    %102 = arith.truncf %101 : vector<8x128xf32> to vector<8x128xbf16>
    %c0_52 = arith.constant 0 : index
    %c0_53 = arith.constant 0 : index
    %c0_54 = arith.constant 0 : index
    %103 = vector.load %arg14[%c0_52, %c0_53, %c0_54] : memref<1x128x64xbf16, #tpu.memory_space<vmem>>, vector<1x128x64xbf16>
    %104 = vector.shape_cast %103 : vector<1x128x64xbf16> to vector<128x64xbf16>
    %cst_55 = arith.constant dense<0.000000e+00> : vector<8x64xf32>
    %105 = tpu.matmul %102, %104, %cst_55 {dimension_numbers = #tpu.dot_dimension_numbers<[1], [0], [0], [1], [0, 0, 1, 1], [], []>} : vector<8x128xbf16>, vector<128x64xbf16>, vector<8x64xf32> -> vector<8x64xf32>
    %c0_56 = arith.constant 0 : index
    %c0_57 = arith.constant 0 : index
    %c0_58 = arith.constant 0 : index
    %106 = vector.load %arg15[%c0_56, %c0_57, %c0_58] : memref<1x1x64xf32, #tpu.memory_space<vmem>>, vector<1x1x64xf32>
    %107 = vector.shape_cast %106 : vector<1x1x64xf32> to vector<1x64xf32>
    %108 = vector.broadcast %107 : vector<1x64xf32> to vector<8x64xf32>
    %109 = arith.addf %105, %108 : vector<8x64xf32>
    %110 = arith.addf %109, %80 : vector<8x64xf32>
    %c0_59 = arith.constant 0 : index
    %c0_60 = arith.constant 0 : index
    %c0_61 = arith.constant 0 : index
    %111 = vector.load %arg16[%c0_59, %c0_60, %c0_61] : memref<1x1x64xf32, #tpu.memory_space<vmem>>, vector<1x1x64xf32>
    %112 = vector.shape_cast %111 : vector<1x1x64xf32> to vector<1x64xf32>
    %c0_62 = arith.constant 0 : index
    %c0_63 = arith.constant 0 : index
    %c0_64 = arith.constant 0 : index
    %113 = vector.load %arg17[%c0_62, %c0_63, %c0_64] : memref<1x1x64xf32, #tpu.memory_space<vmem>>, vector<1x1x64xf32>
    %114 = vector.shape_cast %113 : vector<1x1x64xf32> to vector<1x64xf32>
    %cst_65 = arith.constant dense<0.000000e+00> : vector<8xf32>
    %115 = vector.multi_reduction <add>, %110, %cst_65 [1] : vector<8x64xf32> to vector<8xf32>
    %116 = vector.shape_cast %115 : vector<8xf32> to vector<8x1xf32>
    %cst_66 = arith.constant 6.400000e+01 : f32
    %117 = vector.broadcast %cst_66 : f32 to vector<8x1xf32>
    %118 = arith.divf %116, %117 : vector<8x1xf32>
    %119 = vector.broadcast %118 : vector<8x1xf32> to vector<8x64xf32>
    %120 = arith.subf %110, %119 : vector<8x64xf32>
    %121 = arith.mulf %120, %120 : vector<8x64xf32>
    %cst_67 = arith.constant dense<0.000000e+00> : vector<8xf32>
    %122 = vector.multi_reduction <add>, %121, %cst_67 [1] : vector<8x64xf32> to vector<8xf32>
    %123 = vector.shape_cast %122 : vector<8xf32> to vector<8x1xf32>
    %cst_68 = arith.constant 6.400000e+01 : f32
    %124 = vector.broadcast %cst_68 : f32 to vector<8x1xf32>
    %125 = arith.divf %123, %124 : vector<8x1xf32>
    %126 = vector.broadcast %118 : vector<8x1xf32> to vector<8x64xf32>
    %127 = arith.subf %110, %126 : vector<8x64xf32>
    %cst_69 = arith.constant 9.99999996E-13 : f32
    %128 = vector.broadcast %cst_69 : f32 to vector<8x1xf32>
    %129 = arith.addf %125, %128 : vector<8x1xf32>
    %130 = math.rsqrt %129 : vector<8x1xf32>
    %131 = vector.broadcast %130 : vector<8x1xf32> to vector<8x64xf32>
    %132 = arith.mulf %127, %131 : vector<8x64xf32>
    %133 = vector.broadcast %112 : vector<1x64xf32> to vector<8x64xf32>
    %134 = arith.mulf %132, %133 : vector<8x64xf32>
    %135 = vector.broadcast %114 : vector<1x64xf32> to vector<8x64xf32>
    %136 = arith.addf %134, %135 : vector<8x64xf32>
    %c0_70 = arith.constant 0 : index
    %c0_71 = arith.constant 0 : index
    %137 = vector.load %arg23[%c0_70, %c0_71] : memref<8x64xf32, #tpu.memory_space<vmem>>, vector<8x64xf32>
    tpu.vector_store %arg23[%c0_70, %c0_71], %136 {strides = array<i32>} : memref<8x64xf32, #tpu.memory_space<vmem>>, vector<8x64xf32>,
    %c1_i32 = arith.constant 1 : i32
    %138 = arith.cmpi eq, %arg1, %c1_i32 : i32
    %139 = arith.extui %138 : i1 to i32
    %c0_i32_72 = arith.constant 0 : i32
    %140 = arith.cmpi ne, %139, %c0_i32_72 : i32
    scf.if %140 {
      %141 = vector.extract_strided_slice %136 {offsets = [0, 0], sizes = [1, 64], strides = [1, 1]} : vector<8x64xf32> to vector<1x64xf32>
      %142 = arith.truncf %141 : vector<1x64xf32> to vector<1x64xbf16>
      %c0_73 = arith.constant 0 : index
      %c0_74 = arith.constant 0 : index
      %143 = vector.load %arg18[%c0_73, %c0_74] : memref<64x32xbf16, #tpu.memory_space<vmem>>, vector<64x32xbf16>
      %cst_75 = arith.constant dense<0.000000e+00> : vector<1x32xf32>
      %144 = tpu.matmul %142, %143, %cst_75 {dimension_numbers = #tpu.dot_dimension_numbers<[1], [0], [0], [1], [0, 0, 1, 1], [], []>} : vector<1x64xbf16>, vector<64x32xbf16>, vector<1x32xf32> -> vector<1x32xf32>
      %c0_76 = arith.constant 0 : index
      %c0_77 = arith.constant 0 : index
      %145 = vector.load %arg19[%c0_76, %c0_77] : memref<1x32xf32, #tpu.memory_space<vmem>>, vector<1x32xf32>
      %146 = arith.addf %144, %145 : vector<1x32xf32>
      %cst_78 = arith.constant 0.000000e+00 : f32
      %147 = vector.broadcast %cst_78 : f32 to vector<1x32xf32>
      %148 = arith.maximumf %146, %147 : vector<1x32xf32>
      %149 = arith.truncf %148 : vector<1x32xf32> to vector<1x32xbf16>
      %c0_79 = arith.constant 0 : index
      %c0_80 = arith.constant 0 : index
      %150 = vector.load %arg20[%c0_79, %c0_80] : memref<32x5xbf16, #tpu.memory_space<vmem>>, vector<32x5xbf16>
      %cst_81 = arith.constant dense<0.000000e+00> : vector<1x5xf32>
      %151 = tpu.matmul %149, %150, %cst_81 {dimension_numbers = #tpu.dot_dimension_numbers<[1], [0], [0], [1], [0, 0, 1, 1], [], []>} : vector<1x32xbf16>, vector<32x5xbf16>, vector<1x5xf32> -> vector<1x5xf32>
      %c0_82 = arith.constant 0 : index
      %c0_83 = arith.constant 0 : index
      %152 = vector.load %arg21[%c0_82, %c0_83] : memref<1x5xf32, #tpu.memory_space<vmem>>, vector<1x5xf32>
      %153 = arith.addf %151, %152 : vector<1x5xf32>
      %154 = arith.negf %153 : vector<1x5xf32>
      %155 = math.exp %154 : vector<1x5xf32>
      %cst_84 = arith.constant 1.000000e+00 : f32
      %156 = vector.broadcast %cst_84 : f32 to vector<1x5xf32>
      %157 = arith.addf %156, %155 : vector<1x5xf32>
      %158 = arith.divf %156, %157 : vector<1x5xf32>
      %c0_85 = arith.constant 0 : index
      %c0_86 = arith.constant 0 : index
      %c0_87 = arith.constant 0 : index
      %159 = vector.load %arg22[%c0_85, %c0_86, %c0_87] : memref<1x1x5xf32, #tpu.memory_space<vmem>>, vector<1x1x5xf32>
      %160 = vector.shape_cast %159 : vector<1x1x5xf32> to vector<1x5xf32>
      %161 = vector.shape_cast %158 : vector<1x5xf32> to vector<1x1x5xf32>
      tpu.vector_store %arg22[%c0_85, %c0_86, %c0_87], %161 {strides = array<i32>} : memref<1x1x5xf32, #tpu.memory_space<vmem>>, vector<1x1x5xf32>,
    } else {
    }
    return
  }
  func.func @transform_0(%arg0: i32, %arg1: i32) -> (i32, i32, i32) {
    %c0_i32 = arith.constant 0 : i32
    %c0_i32_0 = arith.constant 0 : i32
    %c0_i32_1 = arith.constant 0 : i32
    return %arg0, %c0_i32, %c0_i32_0 : i32, i32, i32
  }
  func.func @transform_1(%arg0: i32, %arg1: i32) -> (i32, i32, i32) {
    %c0_i32 = arith.constant 0 : i32
    %c0_i32_0 = arith.constant 0 : i32
    %c0_i32_1 = arith.constant 0 : i32
    return %arg0, %c0_i32, %c0_i32_0 : i32, i32, i32
  }
  func.func @transform_2(%arg0: i32, %arg1: i32) -> (i32, i32) {
    %c0_i32 = arith.constant 0 : i32
    %c0_i32_0 = arith.constant 0 : i32
    %c0_i32_1 = arith.constant 0 : i32
    return %c0_i32, %c0_i32_0 : i32, i32
  }
  func.func @transform_3(%arg0: i32, %arg1: i32) -> (i32, i32) {
    %c0_i32 = arith.constant 0 : i32
    %c0_i32_0 = arith.constant 0 : i32
    %c0_i32_1 = arith.constant 0 : i32
    return %c0_i32, %c0_i32_0 : i32, i32
  }
  func.func @transform_4(%arg0: i32, %arg1: i32) -> (i32, i32, i32, i32) {
    %c0_i32 = arith.constant 0 : i32
    %c0_i32_0 = arith.constant 0 : i32
    %c0_i32_1 = arith.constant 0 : i32
    %c0_i32_2 = arith.constant 0 : i32
    return %arg1, %c0_i32, %c0_i32_0, %c0_i32_1 : i32, i32, i32, i32
  }
  func.func @transform_5(%arg0: i32, %arg1: i32) -> (i32, i32, i32, i32) {
    %c0_i32 = arith.constant 0 : i32
    %c0_i32_0 = arith.constant 0 : i32
    %c0_i32_1 = arith.constant 0 : i32
    %c0_i32_2 = arith.constant 0 : i32
    return %arg1, %c0_i32, %c0_i32_0, %c0_i32_1 : i32, i32, i32, i32
  }
  func.func @transform_6(%arg0: i32, %arg1: i32) -> (i32, i32, i32, i32) {
    %c0_i32 = arith.constant 0 : i32
    %c0_i32_0 = arith.constant 0 : i32
    %c0_i32_1 = arith.constant 0 : i32
    %c0_i32_2 = arith.constant 0 : i32
    return %arg1, %c0_i32, %c0_i32_0, %c0_i32_1 : i32, i32, i32, i32
  }
  func.func @transform_7(%arg0: i32, %arg1: i32) -> (i32, i32, i32) {
    %c0_i32 = arith.constant 0 : i32
    %c0_i32_0 = arith.constant 0 : i32
    %c0_i32_1 = arith.constant 0 : i32
    return %arg1, %c0_i32, %c0_i32_0 : i32, i32, i32
  }
  func.func @transform_8(%arg0: i32, %arg1: i32) -> (i32, i32, i32) {
    %c0_i32 = arith.constant 0 : i32
    %c0_i32_0 = arith.constant 0 : i32
    %c0_i32_1 = arith.constant 0 : i32
    return %arg1, %c0_i32, %c0_i32_0 : i32, i32, i32
  }
  func.func @transform_9(%arg0: i32, %arg1: i32) -> (i32, i32, i32) {
    %c0_i32 = arith.constant 0 : i32
    %c0_i32_0 = arith.constant 0 : i32
    %c0_i32_1 = arith.constant 0 : i32
    return %arg1, %c0_i32, %c0_i32_0 : i32, i32, i32
  }
  func.func @transform_10(%arg0: i32, %arg1: i32) -> (i32, i32, i32) {
    %c0_i32 = arith.constant 0 : i32
    %c0_i32_0 = arith.constant 0 : i32
    %c0_i32_1 = arith.constant 0 : i32
    return %arg1, %c0_i32, %c0_i32_0 : i32, i32, i32
  }
  func.func @transform_11(%arg0: i32, %arg1: i32) -> (i32, i32, i32) {
    %c0_i32 = arith.constant 0 : i32
    %c0_i32_0 = arith.constant 0 : i32
    %c0_i32_1 = arith.constant 0 : i32
    return %arg1, %c0_i32, %c0_i32_0 : i32, i32, i32
  }
  func.func @transform_12(%arg0: i32, %arg1: i32) -> (i32, i32, i32) {
    %c0_i32 = arith.constant 0 : i32
    %c0_i32_0 = arith.constant 0 : i32
    %c0_i32_1 = arith.constant 0 : i32
    return %arg1, %c0_i32, %c0_i32_0 : i32, i32, i32
  }
  func.func @transform_13(%arg0: i32, %arg1: i32) -> (i32, i32, i32) {
    %c0_i32 = arith.constant 0 : i32
    %c0_i32_0 = arith.constant 0 : i32
    %c0_i32_1 = arith.constant 0 : i32
    return %arg1, %c0_i32, %c0_i32_0 : i32, i32, i32
  }
  func.func @transform_14(%arg0: i32, %arg1: i32) -> (i32, i32, i32) {
    %c0_i32 = arith.constant 0 : i32
    %c0_i32_0 = arith.constant 0 : i32
    %c0_i32_1 = arith.constant 0 : i32
    return %arg1, %c0_i32, %c0_i32_0 : i32, i32, i32
  }
  func.func @transform_15(%arg0: i32, %arg1: i32) -> (i32, i32, i32) {
    %c0_i32 = arith.constant 0 : i32
    %c0_i32_0 = arith.constant 0 : i32
    %c0_i32_1 = arith.constant 0 : i32
    return %arg1, %c0_i32, %c0_i32_0 : i32, i32, i32
  }
  func.func @transform_16(%arg0: i32, %arg1: i32) -> (i32, i32) {
    %c0_i32 = arith.constant 0 : i32
    %c0_i32_0 = arith.constant 0 : i32
    %c0_i32_1 = arith.constant 0 : i32
    return %c0_i32, %c0_i32_0 : i32, i32
  }
  func.func @transform_17(%arg0: i32, %arg1: i32) -> (i32, i32) {
    %c0_i32 = arith.constant 0 : i32
    %c0_i32_0 = arith.constant 0 : i32
    %c0_i32_1 = arith.constant 0 : i32
    return %c0_i32, %c0_i32_0 : i32, i32
  }
  func.func @transform_18(%arg0: i32, %arg1: i32) -> (i32, i32) {
    %c0_i32 = arith.constant 0 : i32
    %c0_i32_0 = arith.constant 0 : i32
    %c0_i32_1 = arith.constant 0 : i32
    return %c0_i32, %c0_i32_0 : i32, i32
  }
  func.func @transform_19(%arg0: i32, %arg1: i32) -> (i32, i32) {
    %c0_i32 = arith.constant 0 : i32
    %c0_i32_0 = arith.constant 0 : i32
    %c0_i32_1 = arith.constant 0 : i32
    return %c0_i32, %c0_i32_0 : i32, i32
  }
  func.func @transform_20(%arg0: i32, %arg1: i32) -> (i32, i32, i32) {
    %c0_i32 = arith.constant 0 : i32
    %c0_i32_0 = arith.constant 0 : i32
    %c0_i32_1 = arith.constant 0 : i32
    return %arg0, %c0_i32, %c0_i32_0 : i32, i32, i32
  }
}

</mosaic_0001>

<bundles_post_ra>
// kernel: tpu_custom_call.1
= control target key start
LH: loop header
LB: loop body
LE: loop exit
PB: predicated region body
PF: predicated region fallthrough
CT: control target
= control target key end

     0   :  { %s4578_s0 = inlined_call_operand.vmem [shape: f32[2,8,64], index: 0, kind: input, shape index: {}]   ;;  %s4579_s1 = inlined_call_operand.vmem [shape: f32[2,1,8], index: 1, kind: input, shape index: {}]   ;;  %s4580_s2 = inlined_call_operand.vmem [shape: f32[1,64], index: 2, kind: input, shape index: {}]   ;;  %s4581_s3 = inlined_call_operand.vmem [shape: f32[1,64], index: 3, kind: input, shape index: {}]   ;;  %s4582_s4 = inlined_call_operand.vmem [shape: bf16[2,12,64,16], index: 4, kind: input, shape index: {}]   ;;  %s4583_s5 = inlined_call_operand.vmem [shape: f32[2,12,1,16], index: 5, kind: input, shape index: {}]   ;;  %s4584_s6 = inlined_call_operand.vmem [shape: bf16[2,4,16,64], index: 6, kind: input, shape index: {}]   ;;  %s4585_s7 = inlined_call_operand.vmem [shape: f32[2,1,64], index: 7, kind: input, shape index: {}]   ;;  %s4586_s8 = inlined_call_operand.vmem [shape: f32[2,1,64], index: 8, kind: input, shape index: {}]   ;;  %s4587_s9 = inlined_call_operand.vmem [shape: f32[2,1,64], index: 9, kind: input, shape index: {}]   ;;  %s4588_s10 = inlined_call_operand.vmem [shape: bf16[2,64,128], index: 10, kind: input, shape index: {}]   ;;  %s4589_s11 = inlined_call_operand.vmem [shape: f32[2,1,128], index: 11, kind: input, shape index: {}]   ;;  %s4590_s12 = inlined_call_operand.vmem [shape: bf16[2,128,64], index: 12, kind: input, shape index: {}]   ;;  %s4591_s13 = inlined_call_operand.vmem [shape: f32[2,1,64], index: 13, kind: input, shape index: {}]   ;;  %s4592_s14 = inlined_call_operand.vmem [shape: f32[2,1,64], index: 14, kind: input, shape index: {}]   ;;  %s4593_s15 = inlined_call_operand.vmem [shape: f32[2,1,64], index: 15, kind: input, shape index: {}]   ;;  %s4594_s16 = inlined_call_operand.vmem [shape: bf16[64,32], index: 16, kind: input, shape index: {}]   ;;  %s4595_s17 = inlined_call_operand.vmem [shape: f32[1,32], index: 17, kind: input, shape index: {}]   ;;  %s4596_s18 = inlined_call_operand.vmem [shape: bf16[32,5], index: 18, kind: input, shape index: {}]   ;;  %s4597_s19 = inlined_call_operand.vmem [shape: f32[1,5], index: 19, kind: input, shape index: {}]   ;;  %s4598_s20 = inlined_call_operand.hbm [shape: f32[2,1,5], index: 20, kind: output, shape index: {}]  }
   0x1   :  { %4615 = sst [smem:[#allocation19_spill]] %s4578_s0 }
   0x2   :  { %4616 = sst [smem:[#allocation20_spill]] %s4579_s1 }
   0x3   :  { %4617 = sst [smem:[#allocation21_spill]] %s4580_s2 }
   0x4   :  { %4618 = sst [smem:[#allocation22_spill]] %s4581_s3 }
   0x5   :  { %4619 = sst [smem:[#allocation23_spill]] %s4582_s4 }
   0x6   :  { %4620 = sst [smem:[#allocation24_spill]] %s4583_s5 }
   0x7   :  { %4621 = sst [smem:[#allocation25_spill]] %s4584_s6 }
   0x8   :  { %4622 = sst [smem:[#allocation26_spill]] %s4588_s10 }
   0x9   :  { %4623 = sst [smem:[#allocation27_spill]] %s4593_s15 }
   0xa   :  { %4624 = sst [smem:[#allocation28_spill]] %s4594_s16 }
   0xb   :  { %4625 = sst [smem:[#allocation29_spill]] %s4595_s17 }
   0xc   :  { %4626 = sst [smem:[#allocation30_spill]] %s4596_s18 }
   0xd   :  { %4627 = sst [smem:[#allocation31_spill]] %s4597_s19 }
   0xe   :  { %4628 = sst [smem:[#allocation32_spill]] %s4598_s20 }
   0xf   :  { %25 = vsyncpa [#allocation4], 0 }
  0x10   :  { %27 = vsyncpa [#allocation4 + $0x1], 0  ;;  %s4029_s1 = smov 0   ;;  %s4031_s22 = smov 0  }
  0x11   :  { %s4033_s23 = smov 0   ;;  %s4035_s24 = smov 0  }
  0x12   :  { %s4037_s2 = smov 0   ;;  %s4039_s25 = smov 0  }
  0x13   :  { %s4041_s3 = smov 0   ;;  %s4043_s26 = smov 0  }
  0x14 LB: > { %4629 = sst [smem:[#allocation6_spill]] %s3889_s1  ;;  %s3133_s27 = sadd.s32 4294967295, %s3917_s26   ;;  %s3917_s26 = sphi %s4043_s26, %s33_s26   ;;  %s3913_s3 = sphi %s4041_s3, %s4682_s3   ;;  %s3909_s25 = sphi %s4039_s25, %s4681_s25   ;;  %s3905_s2 = sphi %s4037_s2, %s4680_s2   ;;  %s3901_s24 = sphi %s4035_s24, %s4679_s24   ;;  %s3897_s23 = sphi %s4033_s23, %s4678_s23   ;;  %s3893_s22 = sphi %s4031_s22, %s4684_s22   ;;  %s3889_s1 = sphi %s4029_s1, %s4683_s1  }
  0x15   : > { %4630 = sst [smem:[#allocation7_spill]] %s3897_s23  ;;  %s3134_s28 = sadd.s32 4294967294, %s3917_s26  }
  0x16   : > { %4631 = sst [smem:[#allocation8_spill]] %s3901_s24  ;;  %s42_s4 = sadd.s32 1, %s3909_s25 }
  0x17   : > { %4632 = sst [smem:[#allocation9_spill]] %s3905_s2  ;;  %p43_p0 = scmp.ge.s32.totalorder %s42_s4, 2 }
  0x18   : > { %4633 = sst [smem:[#allocation10_spill]] %s3909_s25  ;;  %s45_s29 = sadd.s32 1, %s3913_s3 }
  0x19   : > { %4634 = sst [smem:[#allocation11_spill]] %s3913_s3  ;;  %p552_p1 = scmp.ne.s32.totalorder %s3897_s23, %s3893_s22 }
  0x1a   : > { %4635 = sst [smem:[#allocation12_spill]] %s3917_s26  ;;  %p553_p2 = scmp.eq.s32.totalorder %s3133_s27, 3 }
  0x1b   : > { %s4686_s4 = smov (%p43_p0, %s42_s4), 0  ;;  %s4688_s29 = smov (!%p43_p0, %s45_s29), %s3913_s3 }
  0x1c   : > { %4636 = sst [smem:[#allocation13_spill]] %s4686_s4  ;;  %p4078_p3 = por %p553_p2, %p552_p1 }
  0x1d   : > { %p558_p4 = scmp.ne.s32.totalorder %s3893_s22, %s3889_s1  ;;  %p47_p5 = scmp.ge.s32.totalorder %s4688_s29, 2 }
  0x1e   : > { %s4637_s30 = scalar_select %p4078_p3, 1, 0 }
  0x1f   : > { %p559_p6 = scmp.eq.s32.totalorder %s3134_s28, 3  ;;  %p3137_p7 = scmp.ge.s32.totalorder %s3917_s26, 1 }
  0x20   : > { %4638 = sst [smem:[#allocation14_spill]] %s4637_s30  ;;  %p689_p8 = scmp.lt.s32.totalorder %s3917_s26, 5 }
  0x21   : > { %s4690_s29 = smov (%p47_p5, %s4688_s29), 0  ;;  %p4088_p9 = por %p559_p6, %p558_p4 }
  0x22   : > { %4639 = sst [smem:[#allocation15_spill]] %s4690_s29  ;;  %p690_p10 = pnand %p3137_p7, %p689_p8 }
  0x23   : > { %s4640_s0 = scalar_select %p4088_p9, 1, 0 }
  0x24   : > { %s539_s21 = ssub.s32 %s3913_s3, %s4690_s29  ;;  %s542_s27 = sadd.s32 1, %s3897_s23 }
  0x25   : > { %4641 = sst [smem:[#allocation16_spill]] %s4640_s0  ;;  %p540_p11 = scmp.eq.s32.totalorder %s539_s21, 0 }
  0x26   : > { %693 = sbr.rel (%p690_p10) target bundleno = 3207 (0xc87), region = 100 }
  0x27   : > { %s4096_s4 = scalar_select %p540_p11, %s3897_s23, %s542_s27  }
  0x29   : > { %4642 = sst [smem:[#allocation17_spill]] %s4096_s4 }
  0x2d   : > { %p793_p12 = scmp.lt.s32.totalorder %s3905_s2, 1  ;;  %p800_p13 = scmp.lt.s32.totalorder %s3901_s24, 1 }
  0x2e   : > { %s4645_s1 = sld [smem:[#allocation19_spill]]  ;;  %s4646_s18 = sld [smem:[#allocation23_spill]] }
  0x2f   : > { %s4102_s25 = scalar_select %p793_p12, %s3905_s2, 1 }
  0x30   : > { %s4105_s0 = scalar_select %p800_p13, %s3901_s24, 1 }
  0x31   : > { %4643 = sst [smem:[#allocation18_spill]] %s4102_s25  ;;  %s3138_s21 = sshll.u32 %s4102_s25, 3 }
  0x32   : > { %s3647_s20 = smul.u32 384, %s4105_s0  ;;  %s3270_s2 = sshll.u32 %s4105_s0, 5 }
  0x33   : > { %s3648_s30 = smul.u32 12, %s4105_s0  ;;  %s4647_s6 = sld [smem:[#allocation25_spill]] }
  0x34   : > { %s796_s26 = scalar_lea.vmem %s4645_s1, %s3138_s21  ;;  %s4121_s16 = scalar_lea.vmem %s4646_s18, %s3647_s20 }
  0x35   : > { %s4648_s5 = sld [smem:[#allocation24_spill]]  ;;  %s4649_s10 = sld [smem:[#allocation26_spill]] }
  0x36   : > { %s838_s21 = scalar_lea.vmem %s4591_s13, %s4105_s0  ;;  %s841_s15 = scalar_lea.vmem %s4592_s14, %s4105_s0 }
  0x37   : > { %s4650_s20 = sld [smem:[#allocation27_spill]]  ;;  %s4651_s29 = sand.u32 1, %s3893_s22  }
  0x38   : > { %s4652_s27 = sld [smem:[#allocation8_spill]] }
  0x39   : > { %s4126_s28 = scalar_lea.vmem %s4647_s6, %s3270_s2 }
  0x3b   : > { %s4131_s23 = scalar_lea.vmem %s4648_s5, %s3648_s30  ;;  %s4148_s6 = scalar_lea.vmem %s4649_s10, %s3270_s2 }
  0x3c   : > { %s3272_s5 = sshll.u32 %s4105_s0, 6  ;;  %s4174_s30 = scalar_lea.vmem [#allocation3], %s4651_s29 }
  0x3d   : > { %s4162_s17 = scalar_lea.vmem %s4590_s12, %s3272_s5  ;;  %s844_s10 = scalar_lea.vmem %s4650_s20, %s4105_s0 }
  0x3e   : > { %p3146_p0 = scmp.ne.s32.totalorder %s4652_s27, 0 }
  0x3f   : > { %v850_v0 = vld [vmem:[%s796_s26] sm:$0xff] (!%p3146_p0)  ;;  %vm853_vm0 = vcmask (!%p3146_p0), 523264   ;;  %s4653_s27 = sld [smem:[#allocation21_spill]] (!%p3146_p0)  ;;  %s4654_s4 = sld [smem:[#allocation22_spill]] (!%p3146_p0) }
  0x40   : > { %849 = sbr.rel (%p3146_p0) target bundleno = 378 (0x17a), region = 104  ;;  %v854_v1 = vsel (!%p3146_p0), %vm853_vm0, %v850_v0, 0.0 }
  0x41   : > { %855 = vadd.xlane.f32.xlu0 (!%p3146_p0), %v854_v1 }
  0x45   : > { %v3147_v11 = vld [vmem:[%s4653_s27] ss:$0 sm:$0xff] (!%p3146_p0) }
  0x46   : > { %v3148_v13 = vld [vmem:[%s4654_s4] ss:$0 sm:$0xff] (!%p3146_p0) }
  0xce   : > { %v856_v2 = vpop.xlane.xlu0 %855 }
  0xcf   : > { %v858_v3 = vmul.f32 0.015625, %v856_v2 }
  0xd1   : > { %v859_v4 = vsub.f32 %v850_v0, %v858_v3 }
  0xd3   : > { %v860_v5 = vmul.f32 %v859_v4, %v859_v4 }
  0xd5   : > { %v861_v6 = vsel %vm853_vm0, %v860_v5, 0.0 }
  0xd6   : > { %862 = vadd.xlane.f32.xlu0 %v861_v6 }
 0x163   : > { %v863_v7 = vpop.xlane.xlu0 %862 }
 0x164   : > { %v864_v8 = vmul.f32 0.015625, %v863_v7 }
 0x166   : > { %v865_v9 = vadd.f32 1e-12, %v864_v8 }
 0x168   : > { %3724 = vrsqrt.f32 %v865_v9 }
 0x172   : > { %v3725_v10 = vpop.eup %3724 }
 0x173   : > { %v867_v12 = vmul.f32 %v3725_v10, %v859_v4 }
 0x175   : > { %v874_v14 = vmul.f32 %v3147_v11, %v867_v12 }
 0x177   : > { %v881_v15 = vadd.f32 %v3148_v13, %v874_v14 }
 0x179   : > { %882 = vst.msk [vmem:[#allocation2] sm:$0xff] %vm853_vm0, %v881_v15 }
 0x17a PF: > { %v3726_v16 = vld [vmem:[%s4121_s16] sm:$0xff]   ;;  %v3919_v17 = vmov 0.0   ;;  %v3728_v19 = vld [vmem:[%s4121_s16 + $0x8] sm:$0xff]   ;;  %vm3920_vm1 = vmmov 0   ;;  %v3730_v21 = vld [vmem:[%s4121_s16 + $0x10] sm:$0xff]   ;;  %vm1092_vm2 = vcmask 523264   ;;  %s4658_s2 = scalar_lea.vmem %s4585_s7, %s4105_s0  ;;  %s4659_s5 = scalar_lea.vmem %s4586_s8, %s4105_s0 }
 0x17b   : > { %3379 = vmatprep.subr.bf16.mxu0 %v3919_v17  ;;  %3391 = vmatprep.subr.bf16.mxu1 %v3919_v17  ;;  %v3727_v18 = vld [vmem:[%s4121_s16 + $0x20] sm:$0xff]   ;;  %v3729_v20 = vld [vmem:[%s4121_s16 + $0x28] sm:$0xff]   ;;  %v3731_v22 = vld [vmem:[%s4121_s16 + $0x30] sm:$0xff]   ;;  %vm1858_vm3 = vcmask 130048   ;;  %vm2099_vm4 = vcmask 1043456   ;;  %s4656_s18 = sld [smem:[#allocation20_spill]]  ;;  %s4660_s27 = scalar_lea.vmem %s4587_s9, %s4105_s0 }
 0x17c   : > { %3380 = vmatpush3.bf16.msra.mxu0 %v3726_v16  ;;  %3387 = vmatprep.mubr.msk.bf16.mxu0 %vm3920_vm1, %v3919_v17  ;;  %v3732_v23 = vld [vmem:[%s4121_s16 + $0x18] sm:$0xff]   ;;  %v3734_v27 = vld [vmem:[%s4121_s16 + $0x40] sm:$0xff]   ;;  %v3736_v29 = vld [vmem:[%s4121_s16 + $0x48] sm:$0xff]   ;;  %vm2043_vm6 = vcmask 64512   ;;  %s4661_s4 = scalar_lea.vmem %s4589_s11, %s4105_s0 }
 0x17d   : > { %3392 = vmatpush3.bf16.msra.mxu1 %v3727_v18  ;;  %3381 = vmatprep.subr.bf16.mxu0 %v3919_v17  ;;  %v3733_v25 = vld [vmem:[%s4121_s16 + $0x38] sm:$0xff]   ;;  %v3735_v28 = vld [vmem:[%s4121_s16 + $0x60] sm:$0xff]   ;;  %v3737_v30 = vld [vmem:[%s4121_s16 + $0x68] sm:$0xff]  }
 0x17e   : > { %3393 = vmatprep.subr.bf16.mxu1 %v3919_v17  ;;  %3399 = vmatprep.mubr.msk.bf16.mxu1 %vm3920_vm1, %v3919_v17  ;;  %v3738_v31 = vld [vmem:[%s4121_s16 + $0x50] sm:$0xff]   ;;  %v3740_v33 = vld [vmem:[%s4121_s16 + $0x58] sm:$0xff]   ;;  %v3742_v35 = vld [vmem:[%s4121_s16 + $0x80] sm:$0xff]  }
 0x17f   : > { %v3739_v32 = vld [vmem:[%s4121_s16 + $0x70] sm:$0xff]   ;;  %v3741_v34 = vld [vmem:[%s4121_s16 + $0x78] sm:$0xff]   ;;  %v3743_v36 = vld [vmem:[%s4121_s16 + $0xa0] sm:$0xff]  }
 0x180   : > { %3382 = vmatpush3.bf16.msra.mxu0 %v3728_v19  ;;  %v883_v24 = vld [vmem:[#allocation2] sm:$0xff]  ;;  %v3744_v37 = vld [vmem:[%s4121_s16 + $0x88] sm:$0xff]   ;;  %v3746_v39 = vld [vmem:[%s4121_s16 + $0x90] sm:$0xff]  }
 0x181   : > { %3394 = vmatpush3.bf16.msra.mxu1 %v3729_v20  ;;  %3383 = vmatprep.subr.bf16.mxu0 %v3919_v17  ;;  %v4206_v26 = vpack.c.bf16 %v883_v24, %v883_v24  ;;  %v3745_v38 = vld [vmem:[%s4121_s16 + $0xa8] sm:$0xff]   ;;  %v3747_v40 = vld [vmem:[%s4121_s16 + $0xb0] sm:$0xff]   ;;  %v3748_v41 = vld [vmem:[%s4121_s16 + $0x98] sm:$0xff]  }
 0x182   : > { %3395 = vmatprep.subr.bf16.mxu1 %v3919_v17  ;;  %v3749_v42 = vld [vmem:[%s4121_s16 + $0xb8] sm:$0xff]   ;;  %v3750_v43 = vld [vmem:[%s4121_s16 + $0xc0] sm:$0xff]   ;;  %v3752_v45 = vld [vmem:[%s4121_s16 + $0xc8] sm:$0xff]  }
 0x183   : > { %v3751_v44 = vld [vmem:[%s4121_s16 + $0xe0] sm:$0xff]   ;;  %v3753_v46 = vld [vmem:[%s4121_s16 + $0xe8] sm:$0xff]   ;;  %v3754_v47 = vld [vmem:[%s4121_s16 + $0xd0] sm:$0xff]  }
 0x184   : > { %3384 = vmatpush3.bf16.msra.mxu0 %v3730_v21  ;;  %v3755_v48 = vld [vmem:[%s4121_s16 + $0xf0] sm:$0xff]   ;;  %v3756_v49 = vld [vmem:[%s4121_s16 + $0xd8] sm:$0xff]   ;;  %v3758_v51 = vld [vmem:[%s4121_s16 + $0x100] sm:$0xff]  }
 0x185   : > { %3396 = vmatpush3.bf16.msra.mxu1 %v3731_v22  ;;  %3385 = vmatprep.subr.bf16.mxu0 %v3919_v17  ;;  %v3757_v50 = vld [vmem:[%s4121_s16 + $0xf8] sm:$0xff]   ;;  %v3759_v52 = vld [vmem:[%s4121_s16 + $0x108] sm:$0xff]   ;;  %v3760_v53 = vld [vmem:[%s4121_s16 + $0x110] sm:$0xff]  }
 0x186   : > { %3397 = vmatprep.subr.bf16.mxu1 %v3919_v17  ;;  %v3761_v54 = vld [vmem:[%s4121_s16 + $0x118] sm:$0xff]   ;;  %v3762_v55 = vld [vmem:[%s4121_s16 + $0x120] sm:$0xff]   ;;  %v3764_v57 = vld [vmem:[%s4121_s16 + $0x128] sm:$0xff]  }
 0x187   : > { %v3763_v56 = vld [vmem:[%s4121_s16 + $0x140] sm:$0xff]   ;;  %v3765_v58 = vld [vmem:[%s4121_s16 + $0x148] sm:$0xff]   ;;  %v3766_v59 = vld [vmem:[%s4121_s16 + $0x130] sm:$0xff]  }
 0x188   : > { %3386 = vmatpush3.bf16.msra.mxu0 %v3732_v23  ;;  %v3767_v60 = vld [vmem:[%s4121_s16 + $0x150] sm:$0xff]   ;;  %v3768_v61 = vld [vmem:[%s4121_s16 + $0x138] sm:$0xff]   ;;  %v3770_v63 = vld [vmem:[%s4121_s16 + $0x160] sm:$0xff]  }
 0x189   : > { %3398 = vmatpush3.bf16.msra.mxu1 %v3733_v25  ;;  %3403 = vmatprep.subr.bf16.mxu0 %v3919_v17  ;;  %v3769_v62 = vld [vmem:[%s4121_s16 + $0x158] sm:$0xff]   ;;  %v3771_v0 = vld [vmem:[%s4121_s16 + $0x168] sm:$0xff]   ;;  %v3772_v1 = vld [vmem:[%s4121_s16 + $0x170] sm:$0xff]  }
 0x18a   : > { %3415 = vmatprep.subr.bf16.mxu1 %v3919_v17  ;;  %v3773_v2 = vld [vmem:[%s4121_s16 + $0x178] sm:$0xff]   ;;  %v3153_v20 = vld [vmem:[%s4131_s23 + $0x4] ss:$0 sm:$0xff]  ;;  %v3149_v21 = vld [vmem:[%s4131_s23] ss:$0 sm:$0xff]  ;;  %s4655_s16 = sld [smem:[#allocation18_spill]] }
 0x18b   : > { %3388 = vmatmul.mubr.msk.bf16.vlgmr.msra.gmra.mrb[0].mxu0 %vm1092_vm2, %v4206_v26 }
 0x18c   : > { %3400 = vmatmul.mubr.msk.bf16.vlgmr.msra.gmra.mrb[0].mxu1 %vm1092_vm2, %v4206_v26  ;;  %3404 = vmatpush3.bf16.msra.mxu0 %v3734_v27  ;;  %v3154_v27 = vld [vmem:[%s4131_s23 + $0x5] ss:$0 sm:$0xff] }
 0x18d   : > { %3416 = vmatpush3.bf16.msra.mxu1 %v3735_v28  ;;  %3405 = vmatprep.subr.bf16.mxu0 %v3919_v17 }
 0x18e   : > { %3417 = vmatprep.subr.bf16.mxu1 %v3919_v17  ;;  %3411 = vmatprep.mubr.msk.bf16.mxu0 %vm3920_vm1, %v3919_v17 }
 0x18f   : > { %3423 = vmatprep.mubr.msk.bf16.mxu1 %vm3920_vm1, %v3919_v17 }
 0x190   : > { %3406 = vmatpush3.bf16.msra.mxu0 %v3736_v29  ;;  %s4657_s19 = scalar_lea.vmem %s4656_s18, %s4655_s16 }
 0x191   : > { %3418 = vmatpush3.bf16.msra.mxu1 %v3737_v30  ;;  %3407 = vmatprep.subr.bf16.mxu0 %v3919_v17 }
 0x192   : > { %3419 = vmatprep.subr.bf16.mxu1 %v3919_v17 }
 0x194   : > { %3408 = vmatpush3.bf16.msra.mxu0 %v3738_v31 }
 0x195   : > { %3420 = vmatpush3.bf16.msra.mxu1 %v3739_v32  ;;  %3409 = vmatprep.subr.bf16.mxu0 %v3919_v17 }
 0x196   : > { %3421 = vmatprep.subr.bf16.mxu1 %v3919_v17 }
 0x198   : > { %3410 = vmatpush3.bf16.msra.mxu0 %v3740_v33 }
 0x199   : > { %3422 = vmatpush3.bf16.msra.mxu1 %v3741_v34  ;;  %3427 = vmatprep.subr.bf16.mxu0 %v3919_v17 }
 0x19a   : > { %3439 = vmatprep.subr.bf16.mxu1 %v3919_v17 }
 0x19b   : > { %3412 = vmatmul.mubr.msk.bf16.vlgmr.msra.gmra.mrb[4].mxu0 %vm1092_vm2, %v4206_v26 }
 0x19c   : > { %3424 = vmatmul.mubr.msk.bf16.vlgmr.msra.gmra.mrb[4].mxu1 %vm1092_vm2, %v4206_v26  ;;  %3428 = vmatpush3.bf16.msra.mxu0 %v3742_v35 }
 0x19d   : > { %3440 = vmatpush3.bf16.msra.mxu1 %v3743_v36  ;;  %3429 = vmatprep.subr.bf16.mxu0 %v3919_v17 }
 0x19e   : > { %3441 = vmatprep.subr.bf16.mxu1 %v3919_v17  ;;  %3435 = vmatprep.mubr.msk.bf16.mxu0 %vm3920_vm1, %v3919_v17 }
 0x19f   : > { %3447 = vmatprep.mubr.msk.bf16.mxu1 %vm3920_vm1, %v3919_v17 }
 0x1a0   : > { %3430 = vmatpush3.bf16.msra.mxu0 %v3744_v37  ;;  %v3150_v37 = vld [vmem:[%s4131_s23 + $0x1] ss:$0 sm:$0xff] }
 0x1a1   : > { %3442 = vmatpush3.bf16.msra.mxu1 %v3745_v38  ;;  %3431 = vmatprep.subr.bf16.mxu0 %v3919_v17 }
 0x1a2   : > { %3443 = vmatprep.subr.bf16.mxu1 %v3919_v17 }
 0x1a4   : > { %3432 = vmatpush3.bf16.msra.mxu0 %v3746_v39 }
 0x1a5   : > { %3444 = vmatpush3.bf16.msra.mxu1 %v3747_v40  ;;  %3433 = vmatprep.subr.bf16.mxu0 %v3919_v17 }
 0x1a6   : > { %3445 = vmatprep.subr.bf16.mxu1 %v3919_v17 }
 0x1a8   : > { %3434 = vmatpush3.bf16.msra.mxu0 %v3748_v41 }
 0x1a9   : > { %3446 = vmatpush3.bf16.msra.mxu1 %v3749_v42  ;;  %3451 = vmatprep.subr.bf16.mxu0 %v3919_v17  ;;  %v3155_v42 = vld [vmem:[%s4131_s23 + $0x6] ss:$0 sm:$0xff] }
 0x1aa   : > { %3463 = vmatprep.subr.bf16.mxu1 %v3919_v17 }
 0x1ab   : > { %3436 = vmatmul.mubr.msk.bf16.vlgmr.msra.gmra.mrb[8].mxu0 %vm1092_vm2, %v4206_v26 }
 0x1ac   : > { %3448 = vmatmul.mubr.msk.bf16.vlgmr.msra.gmra.mrb[8].mxu1 %vm1092_vm2, %v4206_v26  ;;  %3452 = vmatpush3.bf16.msra.mxu0 %v3750_v43 }
 0x1ad   : > { %3464 = vmatpush3.bf16.msra.mxu1 %v3751_v44  ;;  %3453 = vmatprep.subr.bf16.mxu0 %v3919_v17  ;;  %v3156_v44 = vld [vmem:[%s4131_s23 + $0x7] ss:$0 sm:$0xff] }
 0x1ae   : > { %3465 = vmatprep.subr.bf16.mxu1 %v3919_v17  ;;  %3459 = vmatprep.mubr.msk.bf16.mxu0 %vm3920_vm1, %v3919_v17 }
 0x1af   : > { %3471 = vmatprep.mubr.msk.bf16.mxu1 %vm3920_vm1, %v3919_v17 }
 0x1b0   : > { %3454 = vmatpush3.bf16.msra.mxu0 %v3752_v45  ;;  %v3151_v45 = vld [vmem:[%s4131_s23 + $0x2] ss:$0 sm:$0xff] }
 0x1b1   : > { %3466 = vmatpush3.bf16.msra.mxu1 %v3753_v46  ;;  %3455 = vmatprep.subr.bf16.mxu0 %v3919_v17 }
 0x1b2   : > { %3467 = vmatprep.subr.bf16.mxu1 %v3919_v17 }
 0x1b4   : > { %3456 = vmatpush3.bf16.msra.mxu0 %v3754_v47  ;;  %v3152_v47 = vld [vmem:[%s4131_s23 + $0x3] ss:$0 sm:$0xff] }
 0x1b5   : > { %3468 = vmatpush3.bf16.msra.mxu1 %v3755_v48  ;;  %3457 = vmatprep.subr.bf16.mxu0 %v3919_v17 }
 0x1b6   : > { %3469 = vmatprep.subr.bf16.mxu1 %v3919_v17 }
 0x1b8   : > { %3458 = vmatpush3.bf16.msra.mxu0 %v3756_v49 }
 0x1b9   : > { %3470 = vmatpush3.bf16.msra.mxu1 %v3757_v50  ;;  %3475 = vmatprep.subr.bf16.mxu0 %v3919_v17 }
 0x1ba   : > { %3487 = vmatprep.subr.bf16.mxu1 %v3919_v17 }
 0x1bb   : > { %3460 = vmatmul.mubr.msk.bf16.vlgmr.msra.gmra.mrb[12].mxu0 %vm1092_vm2, %v4206_v26 }
 0x1bc   : > { %3472 = vmatmul.mubr.msk.bf16.vlgmr.msra.gmra.mrb[12].mxu1 %vm1092_vm2, %v4206_v26  ;;  %3476 = vmatpush3.bf16.msra.mxu0 %v3758_v51 }
 0x1bd   : > { %3477 = vmatprep.subr.bf16.mxu0 %v3919_v17  ;;  %3483 = vmatprep.mubr.msk.bf16.mxu0 %vm3920_vm1, %v3919_v17 }
 0x1be   : > { %3495 = vmatprep.mubr.msk.bf16.mxu1 %vm3920_vm1, %v3919_v17  ;;  %3488 = vmatpush3.bf16.msra.mxu1 %v3762_v55 }
 0x1bf   : > { %3489 = vmatprep.subr.bf16.mxu1 %v3919_v17 }
 0x1c0   : > { %3478 = vmatpush3.bf16.msra.mxu0 %v3759_v52 }
 0x1c1   : > { %3479 = vmatprep.subr.bf16.mxu0 %v3919_v17 }
 0x1c2   : > { %3490 = vmatpush3.bf16.msra.mxu1 %v3764_v57 }
 0x1c3   : > { %3491 = vmatprep.subr.bf16.mxu1 %v3919_v17 }
 0x1c4   : > { %3480 = vmatpush3.bf16.msra.mxu0 %v3760_v53 }
 0x1c5   : > { %3481 = vmatprep.subr.bf16.mxu0 %v3919_v17 }
 0x1c6   : > { %3492 = vmatpush3.bf16.msra.mxu1 %v3766_v59 }
 0x1c7   : > { %3493 = vmatprep.subr.bf16.mxu1 %v3919_v17 }
 0x1c8   : > { %3482 = vmatpush3.bf16.msra.mxu0 %v3761_v54 }
 0x1c9   : > { %3499 = vmatprep.subr.bf16.mxu0 %v3919_v17 }
 0x1ca   : > { %3494 = vmatpush3.bf16.msra.mxu1 %v3768_v61 }
 0x1cb   : > { %3484 = vmatmul.mubr.msk.bf16.vlgmr.msra.gmra.mrb[16].mxu0 %vm1092_vm2, %v4206_v26  ;;  %3511 = vmatprep.subr.bf16.mxu1 %v3919_v17 }
 0x1cc   : > { %3507 = vmatprep.mubr.msk.bf16.mxu0 %vm3920_vm1, %v3919_v17  ;;  %3500 = vmatpush3.bf16.msra.mxu0 %v3763_v56 }
 0x1cd   : > { %3501 = vmatprep.subr.bf16.mxu0 %v3919_v17  ;;  %3496 = vmatmul.mubr.msk.bf16.vlgmr.msra.gmra.mrb[16].mxu1 %vm1092_vm2, %v4206_v26 }
 0x1ce   : > { %3512 = vmatpush3.bf16.msra.mxu1 %v3770_v63  ;;  %3519 = vmatprep.mubr.msk.bf16.mxu1 %vm3920_vm1, %v3919_v17 }
 0x1cf   : > { %3513 = vmatprep.subr.bf16.mxu1 %v3919_v17 }
 0x1d0   : > { %3502 = vmatpush3.bf16.msra.mxu0 %v3765_v58 }
 0x1d1   : > { %3503 = vmatprep.subr.bf16.mxu0 %v3919_v17 }
 0x1d2   : > { %3514 = vmatpush3.bf16.msra.mxu1 %v3771_v0 }
 0x1d3   : > { %3515 = vmatprep.subr.bf16.mxu1 %v3919_v17 }
 0x1d4   : > { %3504 = vmatpush3.bf16.msra.mxu0 %v3767_v60 }
 0x1d5   : > { %3505 = vmatprep.subr.bf16.mxu0 %v3919_v17 }
 0x1d6   : > { %3516 = vmatpush3.bf16.msra.mxu1 %v3772_v1 }
 0x1d7   : > { %3517 = vmatprep.subr.bf16.mxu1 %v3919_v17 }
 0x1d8   : > { %3506 = vmatpush3.bf16.msra.mxu0 %v3769_v62 }
 0x1d9   : > { %3523 = vmatprep.subr.bf16.mxu0 %v3919_v17 }
 0x1da   : > { %3518 = vmatpush3.bf16.msra.mxu1 %v3773_v2 }
 0x1db   : > { %3508 = vmatmul.mubr.msk.bf16.vlgmr.msra.gmra.mrb[20].mxu0 %vm1092_vm2, %v4206_v26  ;;  %3541 = vmatprep.subr.bf16.mxu1 %v3919_v17 }
 0x1dc   : > { %3525 = vmatprep.mubr.msk.bf16.mxu0 %vm3920_vm1, %v3919_v17 }
 0x1dd   : > { %3520 = vmatmul.mubr.msk.bf16.vlgmr.msra.gmra.mrb[20].mxu1 %vm1092_vm2, %v4206_v26 }
 0x1de   : > { %3543 = vmatprep.mubr.msk.bf16.mxu1 %vm3920_vm1, %v3919_v17 }
 0x25e   : > { %v1130_v3 = vpop.f32.mrb[0].mxu0 }
 0x25f   : > { %v3389_v4 = vpop.f32.mrb[1].mxu0  ;;  %v1194_v5 = vpop.f32.mrb[0].mxu1  ;;  %v1131_v29 = vadd.f32 %v3149_v21, %v1130_v3 }
 0x260   : > { %v1133_v6 = vpop.f32.mrb[2].mxu0  ;;  %v3401_v7 = vpop.f32.mrb[1].mxu1  ;;  %v1195_v40 = vadd.f32 %v3150_v37, %v1194_v5  ;;  %v3157_v4 = vld [vmem:[%s4131_s23 + $0x8] ss:$0 sm:$0xff]  ;;  %v1853_v37 = vlaneseq }
 0x261   : > { %v3390_v8 = vpop.f32.mrb[3].mxu0  ;;  %v1197_v9 = vpop.f32.mrb[2].mxu1  ;;  %v1840_v36 = vmul.f32 0.25, %v1131_v29  ;;  %v3160_v29 = vld [vmem:[%s4131_s23 + $0xb] ss:$0 sm:$0xff] }
 0x262   : > { %v3402_v10 = vpop.f32.mrb[3].mxu1  ;;  %v1841_v43 = vmul.f32 0.25, %v1195_v40 }
 0x263   : > { %v1844_v39 = vpack.c.bf16 %v1840_v36, %v1840_v36 }
 0x264   : > { %v1845_v54 = vpack.c.bf16 %v1841_v43, %v1841_v43 }
 0x26e   : > { %v1258_v11 = vpop.f32.mrb[4].mxu0 }
 0x26f   : > { %v3413_v12 = vpop.f32.mrb[5].mxu0  ;;  %v1322_v13 = vpop.f32.mrb[4].mxu1  ;;  %v1259_v55 = vadd.f32 %v3151_v45, %v1258_v11 }
 0x270   : > { %v1261_v14 = vpop.f32.mrb[6].mxu0  ;;  %v3425_v15 = vpop.f32.mrb[5].mxu1  ;;  %v1323_v59 = vadd.f32 %v3152_v47, %v1322_v13  ;;  %v3158_v12 = vld [vmem:[%s4131_s23 + $0x9] ss:$0 sm:$0xff]  ;;  %v3159_v13 = vld [vmem:[%s4131_s23 + $0xa] ss:$0 sm:$0xff] }
 0x271   : > { %v3414_v16 = vpop.f32.mrb[7].mxu0  ;;  %v1325_v18 = vpop.f32.mrb[6].mxu1  ;;  %v1842_v0 = vmul.f32 0.25, %v1259_v55 }
 0x272   : > { %v3426_v19 = vpop.f32.mrb[7].mxu1  ;;  %v1843_v1 = vmul.f32 0.25, %v1323_v59 }
 0x273   : > { %v1846_v2 = vpack.c.bf16 %v1842_v0, %v1842_v0 }
 0x274   : > { %v1847_v3 = vpack.c.bf16 %v1843_v1, %v1843_v1 }
 0x27e   : > { %v1386_v22 = vpop.f32.mrb[8].mxu0 }
 0x27f   : > { %v1387_v23 = vadd.f32 %v3153_v20, %v1386_v22  ;;  %v3437_v24 = vpop.f32.mrb[9].mxu0  ;;  %v1450_v25 = vpop.f32.mrb[8].mxu1 }
 0x280   : > { %v1389_v26 = vpop.f32.mrb[10].mxu0  ;;  %v3449_v28 = vpop.f32.mrb[9].mxu1  ;;  %v1451_v35 = vadd.f32 %v3154_v27, %v1450_v25 }
 0x281   : > { %v1848_v30 = vpack.c.bf16 %v1387_v23, %v1387_v23  ;;  %v3438_v31 = vpop.f32.mrb[11].mxu0  ;;  %v1453_v32 = vpop.f32.mrb[10].mxu1 }
 0x282   : > { %v3450_v33 = vpop.f32.mrb[11].mxu1  ;;  %v1849_v38 = vpack.c.bf16 %v1451_v35, %v1451_v35 }
 0x283   : > { %v1863_v34 = vsel %vm1858_vm3, %v1848_v30, 0 }
 0x284   : > { %3524 = vmatpush3.bf16.xpose.msra.mxu0 %v1863_v34  ;;  %v1909_v41 = vsel %vm1858_vm3, %v1849_v38, 0  ;;  %v884_v38 = vld [vmem:[%s4657_s19] sm:$0x1] }
 0x285   : > { %3529 = vmatprep.subr.bf16.mxu0 %v3919_v17  ;;  %vm885_vm5 = vcmp.lt.f32.partialorder %v884_v38, 0.5 }
 0x28b   : > { %3526 = vmatmul.mubr.msk.bf16.vlgmr.msra.gmra.mrb[24].mxu0 %vm1858_vm3, %v1844_v39  ;;  %v1854_v39 = vshrl.u32 %v1853_v37, 7 }
 0x28c   : > { %3530 = vmatpush3.bf16.xpose.msra.mxu0 %v1909_v41  ;;  %3531 = vmatprep.mubr.msk.bf16.mxu0 %vm3920_vm1, %v3919_v17  ;;  %v886_v41 = vsel %vm885_vm5, -1e+09, %v3919_v17 }
 0x28d   : > { %3535 = vmatprep.subr.bf16.mxu0 %v3919_v17  ;;  %v1855_v40 = vsub.s32 0, %v1854_v39 }
 0x28e   : > { %v1514_v46 = vpop.f32.mrb[12].mxu0 }
 0x28f   : > { %v1515_v48 = vadd.f32 %v3155_v42, %v1514_v46  ;;  %v1578_v49 = vpop.f32.mrb[12].mxu1  ;;  %v3461_v50 = vpop.f32.mrb[13].mxu0  ;;  %v1856_v42 = vrot.slane %v886_v41, %v1855_v40  ;;  %v3775_v41 = vld [vmem:[%s4126_s28 + $0x8] sm:$0xff]  }
 0x290   : > { %v1579_v51 = vadd.f32 %v3156_v44, %v1578_v49  ;;  %v1517_v52 = vpop.f32.mrb[14].mxu0  ;;  %v3473_v53 = vpop.f32.mrb[13].mxu1 }
 0x291   : > { %v1850_v56 = vpack.c.bf16 %v1515_v48, %v1515_v48  ;;  %v3462_v57 = vpop.f32.mrb[15].mxu0  ;;  %v1581_v58 = vpop.f32.mrb[14].mxu1 }
 0x292   : > { %v1851_v60 = vpack.c.bf16 %v1579_v51, %v1579_v51  ;;  %v3474_v61 = vpop.f32.mrb[15].mxu1 }
 0x293   : > { %v1955_v62 = vsel %vm1858_vm3, %v1850_v56, 0  ;;  %3532 = vmatmul.mubr.msk.bf16.vlgmr.msra.gmra.mrb[28].mxu0 %vm1858_vm3, %v1845_v54 }
 0x294   : > { %v2001_v63 = vsel %vm1858_vm3, %v1851_v60, 0  ;;  %3536 = vmatpush3.bf16.xpose.msra.mxu0 %v1955_v62  ;;  %3537 = vmatprep.mubr.msk.bf16.mxu0 %vm3920_vm1, %v3919_v17 }
 0x295   : > { %3542 = vmatpush3.bf16.xpose.msra.mxu1 %v2001_v63  ;;  %3547 = vmatprep.subr.bf16.mxu0 %v3919_v17 }
 0x296   : > { %3553 = vmatprep.subr.bf16.mxu1 %v3919_v17 }
 0x29b   : > { %3538 = vmatmul.mubr.msk.bf16.vlgmr.msra.gmra.mrb[32].mxu0 %vm1858_vm3, %v1846_v2 }
 0x29c   : > { %3544 = vmatmul.mubr.msk.bf16.vlgmr.msra.gmra.mrb[24].mxu1 %vm1858_vm3, %v1847_v3  ;;  %3549 = vmatprep.mubr.msk.bf16.mxu0 %vm3920_vm1, %v3919_v17 }
 0x29d   : > { %3555 = vmatprep.mubr.msk.bf16.mxu1 %vm3920_vm1, %v3919_v17 }
 0x29e   : > { %v1642_v5 = vpop.f32.mrb[16].mxu0 }
 0x29f   : > { %v1643_v6 = vadd.f32 %v3157_v4, %v1642_v5  ;;  %v3485_v7 = vpop.f32.mrb[17].mxu0 }
 0x2a0   : > { %v1645_v8 = vpop.f32.mrb[18].mxu0  ;;  %v1706_v14 = vpop.f32.mrb[16].mxu1 }
 0x2a1   : > { %v2092_v9 = vpack.c.bf16 %v1643_v6, %v1643_v6  ;;  %v3486_v10 = vpop.f32.mrb[19].mxu0  ;;  %v1707_v16 = vadd.f32 %v3158_v12, %v1706_v14  ;;  %v3497_v18 = vpop.f32.mrb[17].mxu1 }
 0x2a2   : > { %v1709_v21 = vpop.f32.mrb[18].mxu1 }
 0x2a3   : > { %v2101_v11 = vsel %vm2099_vm4, %v2092_v9, 0  ;;  %v2093_v23 = vpack.c.bf16 %v1707_v16, %v1707_v16  ;;  %v3498_v25 = vpop.f32.mrb[19].mxu1 }
 0x2a4   : > { %3548 = vmatpush3.bf16.msra.mxu0 %v2101_v11 }
 0x2a5   : > { %3559 = vmatprep.subr.bf16.mxu0 %v3919_v17  ;;  %v2147_v27 = vsel %vm2099_vm4, %v2093_v23, 0 }
 0x2a6   : > { %3554 = vmatpush3.bf16.msra.mxu1 %v2147_v27 }
 0x2a7   : > { %3565 = vmatprep.subr.bf16.mxu1 %v3919_v17 }
 0x2ae   : > { %v1770_v15 = vpop.f32.mrb[20].mxu0 }
 0x2af   : > { %v1771_v19 = vadd.f32 %v3159_v13, %v1770_v15  ;;  %v3509_v20 = vpop.f32.mrb[21].mxu0 }
 0x2b0   : > { %v1773_v22 = vpop.f32.mrb[22].mxu0  ;;  %v1834_v30 = vpop.f32.mrb[20].mxu1 }
 0x2b1   : > { %v2094_v24 = vpack.c.bf16 %v1771_v19, %v1771_v19  ;;  %v3510_v26 = vpop.f32.mrb[23].mxu0  ;;  %v1835_v31 = vadd.f32 %v3160_v29, %v1834_v30  ;;  %v3521_v32 = vpop.f32.mrb[21].mxu1 }
 0x2b2   : > { %v1837_v33 = vpop.f32.mrb[22].mxu1 }
 0x2b3   : > { %v4373_v28 = vsel %vm2099_vm4, %v2094_v24, 0  ;;  %v2095_v34 = vpack.c.bf16 %v1835_v31, %v1835_v31  ;;  %v3522_v35 = vpop.f32.mrb[23].mxu1 }
 0x2b5   : > { %v4378_v36 = vsel %vm2099_vm4, %v2095_v34, 0 }
 0x35e   : > { %v1899_v43 = vpop.f32.mrb[24].mxu0 }
 0x35f   : > { %v1900_v44 = vadd.f32 %v1899_v43, %v1856_v42  ;;  %v3527_v45 = vpop.f32.mrb[25].mxu0  ;;  %v3776_v43 = vld [vmem:[%s4126_s28 + $0x10] sm:$0xff]  }
 0x360   : > { %v1902_v46 = vpop.f32.mrb[26].mxu0 }
 0x361   : > { %v3528_v47 = vpop.f32.mrb[27].mxu0  ;;  %v2044_v48 = vsel %vm2043_vm6, %v1900_v44, -inf }
 0x362   : > { %2045 = vmax.xlane.f32.xlu0 %v2044_v48 }
 0x366   : > { %v1945_v49 = vpop.f32.mrb[28].mxu0 }
 0x367   : > { %v1946_v50 = vadd.f32 %v1945_v49, %v1856_v42  ;;  %v3533_v51 = vpop.f32.mrb[29].mxu0  ;;  %v3777_v49 = vld [vmem:[%s4126_s28 + $0x18] sm:$0xff]  }
 0x368   : > { %v1948_v52 = vpop.f32.mrb[30].mxu0 }
 0x369   : > { %v3534_v53 = vpop.f32.mrb[31].mxu0  ;;  %v2047_v54 = vsel %vm2043_vm6, %v1946_v50, -inf }
 0x36a   : > { %2048 = vmax.xlane.f32.xlu0 %v2047_v54 }
 0x36e   : > { %v1991_v55 = vpop.f32.mrb[32].mxu0 }
 0x36f   : > { %v1992_v56 = vadd.f32 %v1991_v55, %v1856_v42  ;;  %v2037_v57 = vpop.f32.mrb[24].mxu1  ;;  %v3539_v58 = vpop.f32.mrb[33].mxu0 }
 0x370   : > { %v3545_v59 = vpop.f32.mrb[25].mxu1  ;;  %v1994_v60 = vpop.f32.mrb[34].mxu0  ;;  %v2038_v61 = vadd.f32 %v2037_v57, %v1856_v42 }
 0x371   : > { %v2040_v62 = vpop.f32.mrb[26].mxu1  ;;  %v3540_v63 = vpop.f32.mrb[35].mxu0  ;;  %v2050_v0 = vsel %vm2043_vm6, %v1992_v56, -inf }
 0x372   : > { %v3546_v1 = vpop.f32.mrb[27].mxu1  ;;  %2051 = vmax.xlane.f32.xlu1 %v2050_v0  ;;  %v2053_v2 = vsel %vm2043_vm6, %v2038_v61, -inf }
 0x376   : > { %2054 = vmax.xlane.f32.xlu1 %v2053_v2 }
 0x3ef   : > { %v2046_v3 = vpop.xlane.xlu0 %2045 }
 0x3f0   : > { %v2056_v4 = vsub.f32 %v1900_v44, %v2046_v3 }
 0x3f2   : > { %v2060_v5 = vmul.f32 1.442695, %v2056_v4 }
 0x3f4   : > { %3790 = vpow2.f32 %v2060_v5 }
 0x3f7   : > { %v2049_v6 = vpop.xlane.xlu0 %2048 }
 0x3f8   : > { %v2057_v7 = vsub.f32 %v1946_v50, %v2049_v6 }
 0x3fa   : > { %v2062_v8 = vmul.f32 1.442695, %v2057_v7 }
 0x3fc   : > { %3792 = vpow2.f32 %v2062_v8 }
 0x3fe   : > { %v3791_v9 = vpop.eup %3790 }
 0x3ff   : > { %v2052_v10 = vpop.xlane.xlu1 %2051  ;;  %v2068_v11 = vsel %vm2043_vm6, %v3791_v9, 0.0 }
 0x400   : > { %v2058_v12 = vsub.f32 %v1992_v56, %v2052_v10  ;;  %2069 = vadd.xlane.f32.xlu0 %v2068_v11 }
 0x402   : > { %v2064_v13 = vmul.f32 1.442695, %v2058_v12 }
 0x403   : > { %v2055_v14 = vpop.xlane.xlu1 %2054 }
 0x404   : > { %3794 = vpow2.f32 %v2064_v13  ;;  %v2059_v15 = vsub.f32 %v2038_v61, %v2055_v14 }
 0x406   : > { %v3793_v16 = vpop.eup %3792  ;;  %v2066_v18 = vmul.f32 1.442695, %v2059_v15 }
 0x407   : > { %v2071_v19 = vsel %vm2043_vm6, %v3793_v16, 0.0 }
 0x408   : > { %3796 = vpow2.f32 %v2066_v18  ;;  %2072 = vadd.xlane.f32.xlu1 %v2071_v19 }
 0x40e   : > { %v3795_v20 = vpop.eup %3794 }
 0x40f   : > { %v2074_v21 = vsel %vm2043_vm6, %v3795_v20, 0.0 }
 0x410   : > { %2075 = vadd.xlane.f32.xlu0 %v2074_v21 }
 0x412   : > { %v3797_v22 = vpop.eup %3796 }
 0x413   : > { %v2077_v23 = vsel %vm2043_vm6, %v3797_v22, 0.0 }
 0x414   : > { %2078 = vadd.xlane.f32.xlu1 %v2077_v23 }
 0x48d   : > { %v2070_v24 = vpop.xlane.xlu0 %2069 }
 0x48e   : > { %3798 = vrcp.f32 %v2070_v24 }
 0x495   : > { %v2073_v25 = vpop.xlane.xlu1 %2072 }
 0x496   : > { %3800 = vrcp.f32 %v2073_v25 }
 0x498   : > { %v3799_v26 = vpop.eup %3798 }
 0x499   : > { %v2084_v27 = vmul.f32 %v3799_v26, %v3791_v9  ;;  %v3812_v26 = vld [vmem:[#allocation2] sm:$0xff] }
 0x49b   : > { %v2088_v29 = vpack.c.bf16 %v2084_v27, %v2084_v27 }
 0x49d   : > { %3550 = vmatmul.mubr.msk.bf16.vlgmr.msra.gmra.mrb[36].mxu0 %vm2043_vm6, %v2088_v29  ;;  %v2076_v30 = vpop.xlane.xlu0 %2075 }
 0x49e   : > { %3560 = vmatpush3.bf16.msra.mxu0 %v4373_v28  ;;  %3802 = vrcp.f32 %v2076_v30  ;;  %3561 = vmatprep.mubr.msk.bf16.mxu0 %vm3920_vm1, %v3919_v17 }
 0x49f   : > { %3571 = vmatprep.subr.bf16.mxu0 %v3919_v17 }
 0x4a0   : > { %v3801_v31 = vpop.eup %3800 }
 0x4a1   : > { %v2085_v32 = vmul.f32 %v3801_v31, %v3793_v16  ;;  %v2079_v33 = vpop.xlane.xlu1 %2078 }
 0x4a2   : > { %3804 = vrcp.f32 %v2079_v33 }
 0x4a3   : > { %v2089_v34 = vpack.c.bf16 %v2085_v32, %v2085_v32 }
 0x4a5   : > { %3556 = vmatmul.mubr.msk.bf16.vlgmr.msra.gmra.mrb[28].mxu1 %vm2043_vm6, %v2089_v34 }
 0x4a6   : > { %3566 = vmatpush3.bf16.msra.mxu1 %v4378_v36  ;;  %3567 = vmatprep.mubr.msk.bf16.mxu1 %vm3920_vm1, %v3919_v17  ;;  %v3774_v36 = vld [vmem:[%s4126_s28] sm:$0xff]   ;;  %s4663_s28 = sld [smem:[#allocation8_spill]] }
 0x4a7   : > { %3577 = vmatprep.subr.bf16.mxu1 %v3919_v17 }
 0x4a8   : > { %v3803_v28 = vpop.eup %3802 }
 0x4a9   : > { %v2086_v35 = vmul.f32 %v3803_v28, %v3795_v20  ;;  %v3237_v20 = vld [vmem:[%s4658_s2] ss:$0 sm:$0xff] }
 0x4aa   : > { %v3778_v28 = vld [vmem:[%s4148_s6] sm:$0xff]  }
 0x4ab   : > { %v2090_v37 = vpack.c.bf16 %v2086_v35, %v2086_v35  ;;  %v3779_v35 = vld [vmem:[%s4148_s6 + $0x8] sm:$0xff]  }
 0x4ac   : > { %v3805_v38 = vpop.eup %3804  ;;  %p3257_p1 = scmp.ne.s32.totalorder %s4663_s28, 1 }
 0x4ad   : > { %v2087_v39 = vmul.f32 %v3805_v38, %v3797_v22  ;;  %3562 = vmatmul.mubr.msk.bf16.vlgmr.msra.gmra.mrb[40].mxu0 %vm2043_vm6, %v2090_v37  ;;  %v3780_v37 = vld [vmem:[%s4148_s6 + $0x10] sm:$0xff]   ;;  %v3781_v38 = vld [vmem:[%s4148_s6 + $0x18] sm:$0xff]   ;;  %s4664_s24 = sld [smem:[#allocation28_spill]] (!%p3257_p1)  ;;  %vm3922_vm7 = vmmov (!%p3257_p1), 0   ;;  %s4666_s1 = sld [smem:[#allocation30_spill]] (!%p3257_p1)  ;;  %vm2870_vm8 = vcmask (!%p3257_p1), 261120  }
 0x4ae   : > { %3573 = vmatprep.mubr.msk.bf16.mxu0 %vm3920_vm1, %v3919_v17  ;;  %3572 = vmatpush3.bf16.msra.mxu0 %v3774_v36  ;;  %s4668_s3 = sld [smem:[#allocation29_spill]] (!%p3257_p1)  ;;  %s4669_s28 = sld [smem:[#allocation31_spill]] (!%p3257_p1)  ;;  %vm2920_vm9 = vcmask (!%p3257_p1), 32768  }
 0x4af   : > { %v2091_v40 = vpack.c.bf16 %v2087_v39, %v2087_v39  ;;  %3583 = vmatprep.subr.bf16.mxu0 %v3919_v17  ;;  %v3782_v39 = vld [vmem:[%s4162_s17] sm:$0xff]  }
 0x4b1   : > { %3568 = vmatmul.mubr.msk.bf16.vlgmr.msra.gmra.mrb[32].mxu1 %vm2043_vm6, %v2091_v40 }
 0x4b2   : > { %3579 = vmatprep.mubr.msk.bf16.mxu1 %vm3920_vm1, %v3919_v17  ;;  %3578 = vmatpush3.bf16.msra.mxu1 %v3775_v41 }
 0x4b3   : > { %3589 = vmatprep.subr.bf16.mxu1 %v3919_v17  ;;  %s4665_s29 = smov (!%p3257_p1), %s4664_s24 }
 0x570   : > { %v2137_v42 = vpop.f32.mrb[36].mxu0 }
 0x571   : > { %v2281_v44 = vpack.c.bf16 %v2137_v42, %v2137_v42  ;;  %v3551_v45 = vpop.f32.mrb[37].mxu0 }
 0x572   : > { %v2140_v46 = vpop.f32.mrb[38].mxu0  ;;  %v3239_v45 = vld [vmem:[%s4660_s27] ss:$0 sm:$0xff] }
 0x573   : > { %v3552_v47 = vpop.f32.mrb[39].mxu0  ;;  %3574 = vmatmul.mubr.msk.bf16.vlgmr.msra.gmra.mrb[44].mxu0 %vm1858_vm3, %v2281_v44 }
 0x574   : > { %3584 = vmatpush3.bf16.msra.mxu0 %v3776_v43  ;;  %3585 = vmatprep.mubr.msk.bf16.mxu0 %vm3920_vm1, %v3919_v17  ;;  %v3238_v43 = vld [vmem:[%s4659_s5] ss:$0 sm:$0xff] }
 0x575   : > { %3595 = vmatprep.subr.bf16.mxu0 %v3919_v17 }
 0x578   : > { %v2183_v48 = vpop.f32.mrb[28].mxu1 }
 0x579   : > { %v2282_v50 = vpack.c.bf16 %v2183_v48, %v2183_v48  ;;  %v3557_v51 = vpop.f32.mrb[29].mxu1 }
 0x57a   : > { %v2186_v52 = vpop.f32.mrb[30].mxu1  ;;  %v3785_v51 = vld [vmem:[%s4162_s17 + $0x18] sm:$0xff]  }
 0x57b   : > { %v3558_v53 = vpop.f32.mrb[31].mxu1  ;;  %3580 = vmatmul.mubr.msk.bf16.vlgmr.msra.gmra.mrb[36].mxu1 %vm1858_vm3, %v2282_v50  ;;  %v3784_v50 = vld [vmem:[%s4162_s17 + $0x10] sm:$0xff]   ;;  %v3786_v52 = vld [vmem:[%s4162_s17 + $0x20] sm:$0xff]  }
 0x57c   : > { %3590 = vmatpush3.bf16.msra.mxu1 %v3777_v49  ;;  %3591 = vmatprep.mubr.msk.bf16.mxu1 %vm3920_vm1, %v3919_v17  ;;  %v3783_v49 = vld [vmem:[%s4162_s17 + $0x8] sm:$0xff]  }
 0x57d   : > { %3607 = vmatprep.subr.bf16.mxu1 %v3919_v17  ;;  %v3787_v53 = vld [vmem:[%s4162_s17 + $0x28] sm:$0xff]  }
 0x580   : > { %v2229_v54 = vpop.f32.mrb[40].mxu0 }
 0x581   : > { %v2283_v55 = vpack.c.bf16 %v2229_v54, %v2229_v54  ;;  %v3563_v56 = vpop.f32.mrb[41].mxu0  ;;  %v3788_v54 = vld [vmem:[%s4162_s17 + $0x30] sm:$0xff]  }
 0x582   : > { %v2232_v57 = vpop.f32.mrb[42].mxu0  ;;  %v3240_v56 = vld [vmem:[%s4661_s4] ss:$0 sm:$0xff]  ;;  %s4667_s4 = smov (!%p3257_p1), %s4666_s1 }
 0x583   : > { %v3564_v58 = vpop.f32.mrb[43].mxu0  ;;  %3586 = vmatmul.mubr.msk.bf16.vlgmr.msra.gmra.mrb[48].mxu0 %vm1858_vm3, %v2283_v55  ;;  %v3789_v55 = vld [vmem:[%s4162_s17 + $0x38] sm:$0xff]  }
 0x584   : > { %v2275_v59 = vpop.f32.mrb[32].mxu1  ;;  %3603 = vmatprep.mubr.msk.bf16.mxu0 %vm3920_vm1, %v3919_v17  ;;  %3596 = vmatpush3.bf16.msra.mxu0 %v3778_v28  ;;  %v3816_v28 = vld [vmem:[%s4665_s29 + $0x18] sm:$0xff] (!%p3257_p1)  }
 0x585   : > { %v2284_v60 = vpack.c.bf16 %v2275_v59, %v2275_v59  ;;  %v3569_v61 = vpop.f32.mrb[33].mxu1  ;;  %3597 = vmatprep.subr.bf16.mxu0 %v3919_v17 }
 0x586   : > { %v2278_v62 = vpop.f32.mrb[34].mxu1 }
 0x587   : > { %v3570_v63 = vpop.f32.mrb[35].mxu1  ;;  %3592 = vmatmul.mubr.msk.bf16.vlgmr.msra.gmra.mrb[40].mxu1 %vm1858_vm3, %v2284_v60 }
 0x588   : > { %3623 = vmatprep.mubr.msk.bf16.mxu1 %vm3920_vm1, %v3919_v17  ;;  %3598 = vmatpush3.bf16.msra.mxu0 %v3779_v35 }
 0x589   : > { %3599 = vmatprep.subr.bf16.mxu0 %v3919_v17  ;;  %3608 = vmatpush3.bf16.msra.mxu1 %v3782_v39  ;;  %v2783_v39 = vld [vmem:[%s4668_s3] sm:$0x1] (!%p3257_p1) }
 0x58a   : > { %3609 = vmatprep.subr.bf16.mxu1 %v3919_v17 }
 0x58c   : > { %3600 = vmatpush3.bf16.msra.mxu0 %v3780_v37  ;;  %v3817_v37 = vld [vmem:[%s4666_s1] sm:$0xff] (!%p3257_p1)  }
 0x58d   : > { %3601 = vmatprep.subr.bf16.mxu0 %v3919_v17  ;;  %3610 = vmatpush3.bf16.msra.mxu1 %v3783_v49 }
 0x58e   : > { %3611 = vmatprep.subr.bf16.mxu1 %v3919_v17 }
 0x590   : > { %3602 = vmatpush3.bf16.msra.mxu0 %v3781_v38  ;;  %v3818_v38 = vld [vmem:[%s4667_s4 + $0x8] sm:$0xff] (!%p3257_p1)  }
 0x591   : > { %3612 = vmatpush3.bf16.msra.mxu1 %v3784_v50 }
 0x592   : > { %3613 = vmatprep.subr.bf16.mxu1 %v3919_v17 }
 0x595   : > { %3614 = vmatpush3.bf16.msra.mxu1 %v3785_v51 }
 0x596   : > { %3615 = vmatprep.subr.bf16.mxu1 %v3919_v17 }
 0x599   : > { %3616 = vmatpush3.bf16.msra.mxu1 %v3786_v52 }
 0x59a   : > { %3617 = vmatprep.subr.bf16.mxu1 %v3919_v17 }
 0x59d   : > { %3618 = vmatpush3.bf16.msra.mxu1 %v3787_v53 }
 0x59e   : > { %3619 = vmatprep.subr.bf16.mxu1 %v3919_v17 }
 0x5a1   : > { %3620 = vmatpush3.bf16.msra.mxu1 %v3788_v54 }
 0x5a2   : > { %3621 = vmatprep.subr.bf16.mxu1 %v3919_v17 }
 0x5a5   : > { %3622 = vmatpush3.bf16.msra.mxu1 %v3789_v55 }
 0x646   : > { %v2336_v0 = vpop.f32.mrb[44].mxu0 }
 0x647   : > { %v3575_v1 = vpop.f32.mrb[45].mxu0  ;;  %v2489_v5 = vsel %vm1092_vm2, %v2336_v0, 0.0 }
 0x648   : > { %v2339_v2 = vpop.f32.mrb[46].mxu0 }
 0x649   : > { %v3576_v3 = vpop.f32.mrb[47].mxu0 }
 0x64e   : > { %v2385_v4 = vpop.f32.mrb[36].mxu1 }
 0x64f   : > { %v2490_v6 = vsel %vm1092_vm2, %v2385_v4, 0.0  ;;  %v3581_v7 = vpop.f32.mrb[37].mxu1 }
 0x650   : > { %v2491_v8 = vadd.f32 %v2490_v6, %v2489_v5  ;;  %v2388_v9 = vpop.f32.mrb[38].mxu1  ;;  %v3246_v7 = vld [vmem:[%s838_s21] ss:$0 sm:$0xff] }
 0x651   : > { %v3582_v10 = vpop.f32.mrb[39].mxu1 }
 0x656   : > { %v2434_v11 = vpop.f32.mrb[48].mxu0 }
 0x657   : > { %v2492_v12 = vsel %vm1092_vm2, %v2434_v11, 0.0  ;;  %v3587_v13 = vpop.f32.mrb[49].mxu0 }
 0x658   : > { %v2493_v14 = vadd.f32 %v2492_v12, %v2491_v8  ;;  %v2437_v15 = vpop.f32.mrb[50].mxu0 }
 0x659   : > { %v3588_v16 = vpop.f32.mrb[51].mxu0 }
 0x65a   : > { %v2483_v18 = vpop.f32.mrb[40].mxu1 }
 0x65b   : > { %v2494_v19 = vsel %vm1092_vm2, %v2483_v18, 0.0  ;;  %v3593_v21 = vpop.f32.mrb[41].mxu1 }
 0x65c   : > { %v2495_v22 = vadd.f32 %v2494_v19, %v2493_v14  ;;  %v2486_v23 = vpop.f32.mrb[42].mxu1 }
 0x65d   : > { %v3594_v24 = vpop.f32.mrb[43].mxu1 }
 0x65e   : > { %v2503_v25 = vadd.f32 %v3237_v20, %v2495_v22 }
 0x660   : > { %v2504_v27 = vadd.f32 %v3812_v26, %v2503_v25  ;;  %v3255_v25 = vld [vmem:[%s841_s15] ss:$0 sm:$0xff] }
 0x662   : > { %v2507_v29 = vsel %vm1092_vm2, %v2504_v27, 0.0 }
 0x663   : > { %2508 = vadd.xlane.f32.xlu0 %v2507_v29 }
 0x6f0   : > { %v2509_v30 = vpop.xlane.xlu0 %2508 }
 0x6f1   : > { %v2511_v31 = vmul.f32 0.015625, %v2509_v30 }
 0x6f3   : > { %v2512_v32 = vsub.f32 %v2504_v27, %v2511_v31  ;;  %v3256_v27 = vld [vmem:[%s844_s10] ss:$0 sm:$0xff] }
 0x6f4   : > { %v3813_v31 = vld [vmem:[%s4664_s24] sm:$0xff] (!%p3257_p1)  }
 0x6f5   : > { %v2513_v33 = vmul.f32 %v2512_v32, %v2512_v32 }
 0x6f7   : > { %v2514_v34 = vsel %vm1092_vm2, %v2513_v33, 0.0  ;;  %v3814_v33 = vld [vmem:[%s4665_s29 + $0x8] sm:$0xff] (!%p3257_p1)  }
 0x6f8   : > { %2515 = vadd.xlane.f32.xlu1 %v2514_v34  ;;  %v3815_v34 = vld [vmem:[%s4665_s29 + $0x10] sm:$0xff] (!%p3257_p1)  }
 0x785   : > { %v2516_v40 = vpop.xlane.xlu1 %2515 }
 0x786   : > { %v2517_v36 = vmul.f32 0.015625, %v2516_v40 }
 0x788   : > { %v2518_v41 = vadd.f32 1e-12, %v2517_v36 }
 0x78a   : > { %3806 = vrsqrt.f32 %v2518_v41 }
 0x794   : > { %v3807_v42 = vpop.eup %3806 }
 0x795   : > { %v2520_v44 = vmul.f32 %v3807_v42, %v2512_v32  ;;  %v3921_v32 = vmov (!%p3257_p1), 0.0  }
 0x796   : > { %3627 = vmatprep.subr.bf16.mxu0 (!%p3257_p1), %v3921_v32  ;;  %3639 = vmatprep.subr.bf16.mxu1 (!%p3257_p1), %v3921_v32 }
 0x797   : > { %v2527_v46 = vmul.f32 %v3238_v43, %v2520_v44 }
 0x799   : > { %v2534_v47 = vadd.f32 %v3239_v45, %v2527_v46  ;;  %v2857_v46 = vld [vmem:[%s4669_s28] sm:$0x1] (!%p3257_p1) }
 0x79b   : > { %v2535_v48 = vpack.c.bf16 %v2534_v47, %v2534_v47 }
 0x79d   : > { %3604 = vmatmul.mubr.msk.bf16.vlgmr.msra.gmra.mrb[52].mxu0 %vm1092_vm2, %v2535_v48 }
 0x79e   : > { %3628 = vmatpush3.bf16.msra.mxu0 (!%p3257_p1), %v3813_v31  ;;  %3635 = vmatprep.mubr.msk.bf16.mxu0 (!%p3257_p1), %vm3922_vm7, %v3921_v32 }
 0x79f   : > { %3629 = vmatprep.subr.bf16.mxu0 (!%p3257_p1), %v3921_v32 }
 0x7a2   : > { %3630 = vmatpush3.bf16.msra.mxu0 (!%p3257_p1), %v3814_v33 }
 0x7a3   : > { %3631 = vmatprep.subr.bf16.mxu0 (!%p3257_p1), %v3921_v32 }
 0x7a6   : > { %3632 = vmatpush3.bf16.msra.mxu0 (!%p3257_p1), %v3815_v34 }
 0x7a7   : > { %3633 = vmatprep.subr.bf16.mxu0 (!%p3257_p1), %v3921_v32 }
 0x7aa   : > { %3634 = vmatpush3.bf16.msra.mxu0 (!%p3257_p1), %v3816_v28 }
 0x870   : > { %v2612_v57 = vpop.f32.mrb[52].mxu0 }
 0x871   : > { %v2613_v58 = vadd.f32 %v3240_v56, %v2612_v57  ;;  %v3605_v59 = vpop.f32.mrb[53].mxu0 }
 0x872   : > { %v2615_v60 = vpop.f32.mrb[54].mxu0 }
 0x873   : > { %v2619_v61 = vmul.f32 0.044715, %v2613_v58  ;;  %v3606_v62 = vpop.f32.mrb[55].mxu0  ;;  %v2618_v17 = vmul.f32 0.5, %v2613_v58 }
 0x875   : > { %v2620_v63 = vmul.f32 %v2619_v61, %v2613_v58 }
 0x877   : > { %v2621_v0 = vmul.f32 %v2620_v63, %v2613_v58 }
 0x879   : > { %v2622_v1 = vadd.f32 %v2621_v0, %v2613_v58 }
 0x87b   : > { %v2623_v2 = vmul.f32 0.7978846, %v2622_v1 }
 0x87d   : > { %3808 = vtanh.f32 %v2623_v2 }
 0x887   : > { %v3809_v3 = vpop.eup %3808 }
 0x888   : > { %v2625_v4 = vadd.f32 1.0, %v3809_v3 }
 0x88a   : > { %v2626_v5 = vmul.f32 %v2625_v4, %v2618_v17 }
 0x88c   : > { %v2627_v6 = vpack.c.bf16 %v2626_v5, %v2626_v5 }
 0x88e   : > { %3624 = vmatmul.mubr.bf16.vlgmr.msra.gmra.mrb[44].mxu1 %v2627_v6 }
 0x88f   : > { %3643 = vmatprep.mubr.msk.bf16.mxu1 (!%p3257_p1), %vm3922_vm7, %v3921_v32  ;;  %3640 = vmatpush3.bf16.msra.mxu1 (!%p3257_p1), %v3817_v37 }
 0x890   : > { %3641 = vmatprep.subr.bf16.mxu1 (!%p3257_p1), %v3921_v32 }
 0x893   : > { %3642 = vmatpush3.bf16.msra.mxu1 (!%p3257_p1), %v3818_v38 }
 0x961   : > { %v2733_v8 = vpop.f32.mrb[44].mxu1 }
 0x962   : > { %v2734_v9 = vadd.f32 %v3246_v7, %v2733_v8  ;;  %v3625_v10 = vpop.f32.mrb[45].mxu1 }
 0x963   : > { %v2736_v11 = vpop.f32.mrb[46].mxu1 }
 0x964   : > { %v3626_v12 = vpop.f32.mrb[47].mxu1  ;;  %v2739_v13 = vadd.f32 %v2734_v9, %v2534_v47 }
 0x966   : > { %v2742_v14 = vsel %vm1092_vm2, %v2739_v13, 0.0 }
 0x967   : > { %2743 = vadd.xlane.f32.xlu0 %v2742_v14 }
 0x9f4   : > { %v2744_v15 = vpop.xlane.xlu0 %2743 }
 0x9f5   : > { %v2745_v16 = vmul.f32 0.015625, %v2744_v15 }
 0x9f7   : > { %v2746_v18 = vsub.f32 %v2739_v13, %v2745_v16 }
 0x9f9   : > { %v2747_v19 = vmul.f32 %v2746_v18, %v2746_v18 }
 0x9fb   : > { %v2748_v20 = vsel %vm1092_vm2, %v2747_v19, 0.0 }
 0x9fc   : > { %2749 = vadd.xlane.f32.xlu1 %v2748_v20 }
 0xa89   : > { %v2750_v21 = vpop.xlane.xlu1 %2749 }
 0xa8a   : > { %v2751_v22 = vmul.f32 0.015625, %v2750_v21 }
 0xa8c   : > { %v2752_v23 = vadd.f32 1e-12, %v2751_v22 }
 0xa8e   : > { %3810 = vrsqrt.f32 %v2752_v23 }
 0xa98   : > { %v3811_v24 = vpop.eup %3810 }
 0xa99   : > { %v2754_v26 = vmul.f32 %v3811_v24, %v2746_v18  ;;  %2773 = sbr.rel (%p3257_p1) target bundleno = 3180 (0xc6c), region = 108 }
 0xa9b   : > { %v2761_v29 = vmul.f32 %v3255_v25, %v2754_v26 }
 0xa9d   : > { %v2768_v30 = vadd.f32 %v3256_v27, %v2761_v29 }
 0xa9f   : > { %2769 = vst.msk [vmem:[#allocation2] sm:$0xff] %vm1092_vm2, %v2768_v30  ;;  %v2774_v35 = vpack.c.bf16 (!%p3257_p1), %v2768_v30, %v2768_v30 }
 0xaa1   : > { %3636 = vmatmul.mubr.msk.bf16.vlgmr.msra.gmra.mrb[0].mxu0 %vm1092_vm2, %v2774_v35 }
 0xb74   : > { %v2845_v40 = vpop.f32.mrb[0].mxu0 }
 0xb75   : > { %v2846_v36 = vadd.f32 %v2845_v40, %v2783_v39  ;;  %v3637_v41 = vpop.f32.mrb[1].mxu0 }
 0xb76   : > { %v2848_v42 = vpop.f32.mrb[2].mxu0 }
 0xb77   : > { %v2851_v43 = vmax.f32 %v2846_v36, 0.0  ;;  %v3638_v44 = vpop.f32.mrb[3].mxu0 }
 0xb79   : > { %v2852_v45 = vpack.c.bf16 %v2851_v43, %v2851_v43 }
 0xb7b   : > { %3644 = vmatmul.mubr.msk.bf16.vlgmr.msra.gmra.mrb[0].mxu1 %vm2870_vm8, %v2852_v45 }
 0xc4e   : > { %v2908_v47 = vpop.f32.mrb[0].mxu1 }
 0xc4f   : > { %v2909_v48 = vadd.f32 %v2908_v47, %v2857_v46  ;;  %v3645_v49 = vpop.f32.mrb[1].mxu1 }
 0xc50   : > { %v2911_v50 = vpop.f32.mrb[2].mxu1 }
 0xc51   : > { %v3266_v51 = vmul.f32 -1.442695, %v2909_v48  ;;  %v3646_v52 = vpop.f32.mrb[3].mxu1 }
 0xc53   : > { %3819 = vpow2.f32 %v3266_v51 }
 0xc5d   : > { %v3820_v53 = vpop.eup %3819 }
 0xc5e   : > { %v2917_v54 = vadd.f32 1.0, %v3820_v53 }
 0xc60   : > { %3821 = vrcp.f32 %v2917_v54 }
 0xc6a   : > { %v3822_v55 = vpop.eup %3821 }
 0xc6b   : > { %2921 = vst.msk [vmem:[%s4174_s30] sm:$0x1] %vm2920_vm9, %v3822_v55 }
 0xc6c PF: > { %s4670_s23 = sld [smem:[#allocation9_spill]]  ;;  %s4672_s10 = sld [smem:[#allocation32_spill]] }
 0xc6d   : > { %s2935_s6 = sshll.u32 %s4174_s30, 4  ;;  %s4673_s20 = sand.u32 1, %s3893_s22   ;;  %s2936_s6 = int_to_ptr.vmem [resolvable:$true] %s2935_s6 }
 0xc6e   : > { %s2923_s27 = scalar_lea.sflag [#allocation4], %s4673_s20  ;;  %s3823_s26 = scalar_lea.vmem %s2936_s6, 16 }
 0xc6f   : > { %p3824_p2 = scmp.ne.s32.totalorder %s2936_s6, %s3823_s26  ;;  %s3923_s1 = smov [#allocation3]  }
 0xc70   : > { %s3827_s17 = sshll.u32 %s3923_s1, 4  ;;  %s3828_s17 = int_to_ptr.vmem [resolvable:$false] %s3827_s17 }
 0xc71   : > { %p3825_p4 = pnand %p3824_p2, %p4078_p3  ;;  %s3829_s16 = scalar_lea.vmem %s3828_s17, 32 }
 0xc72   : > { %s3267_s24 = sshll.u32 %s4670_s23, 4  ;;  %p3830_p6 = scmp.lt.s32.totalorder %s2936_s6, %s3828_s17 }
 0xc73   : > { %s4528_s0 = scalar_lea.hbm %s4672_s10, %s3267_s24  ;;  %p3826_p5 = pneg %p3825_p4 }
 0xc74   : > { %p3831_p7 = scmp.lt.s32.totalorder %s3829_s16, %s3823_s26 }
 0xc76   : > { %p3832_p8 = por %p3831_p7, %p3830_p6 }
 0xc78   : > { %p3833_p10 = pnand %p3832_p8, %p3826_p5 }
 0xc7a   : > { %3836 = shalt.err (!%p3833_p10)
}
 0xc7b   : > { %s3837_s30 = scalar_lea.hbm %s4528_s0, 16  ;;  %s3841_s3 = scalar_lea.hbm %s4672_s10, 32 }
 0xc7c   : > { %p3838_p11 = scmp.ne.s32.totalorder %s4528_s0, %s3837_s30  ;;  %p3842_p0 = scmp.lt.u32.totalorder %s4528_s0, %s4672_s10 }
 0xc7d   : > { %p3843_p1 = scmp.lt.u32.totalorder %s3841_s3, %s3837_s30  ;;  %p3845_p4 = scmp.lt.u32.totalorder %s3837_s30, %s4528_s0 }
 0xc7e   : > { %p3839_p12 = pnand %p3838_p11, %p4078_p3 }
 0xc7f   : > { %p3844_p2 = por %p3843_p1, %p3842_p0 }
 0xc80   : > { %p3840_p13 = pneg %p3839_p12 }
 0xc81   : > { %p3846_p5 = por %p3845_p4, %p3844_p2 }
 0xc83   : > { %p3847_p6 = pnand %p3846_p5, %p3840_p13 }
 0xc85   : > { %3850 = shalt.err (!%p3847_p6)
}
 0xc86   : > { %3649 = dma.vmem_to_hbm [thread:$0]  (%p4078_p3), %s2936_s6, 16, %s4528_s0, %s2923_s27  }
 0xc87 PF: > { %s4674_s28 = sld [smem:[#allocation12_spill]]  ;;  %s4675_s23 = sld [smem:[#allocation6_spill]] }
 0xc8d   : > { %p3655_p7 = scmp.ge.s32.totalorder %s4674_s28, 2  ;;  %s2947_s15 = sand.u32 1, %s4675_s23  }
 0xc8e   : > { %s2948_s5 = scalar_lea.sflag [#allocation4], %s2947_s15 }
 0xc8f   : > { %p3652_p8 = pnand %p3655_p7, %p4088_p9 }
 0xc91   : > { %3884 = dma.done.wait (!%p3652_p8), %s2948_s5, 16  }
 0xc92   : > { %3886 = vsyncadd (!%p3652_p8), %s2948_s5, 4294967280  ;;  %s33_s26 = sadd.s32 1, %s4674_s28   ;;  %s4677_s20 = sld [smem:[#allocation7_spill]] }
 0xc93   : > { %p30_p10 = scmp.ge.s32.totalorder %s33_s26, 6   ;;  %s4678_s23 = sld [smem:[#allocation17_spill]] }
 0xc94   : > { %s4679_s24 = sld [smem:[#allocation10_spill]]  ;;  %s4680_s2 = sld [smem:[#allocation11_spill]] }
 0xc95   : > { %s4681_s25 = sld [smem:[#allocation13_spill]]  ;;  %s4682_s3 = sld [smem:[#allocation15_spill]] }
 0xc96   : > { %s4683_s1 = smov %s3893_s22  ;;  %32 = sbr.rel (!%p30_p10) target bundleno = 20 (0x14), region = 182 }
 0xc98   : > { %s4684_s22 = smov %s4677_s20 }
 0xc9d   :  { %2952 = vsyncpa [#allocation4], 1 }
 0xc9e   :  { %2954 = vsyncpa [#allocation4 + $0x1], 1 }

</bundles_post_ra>
